<compile_context>
chip_gen: v5e
topology: v5e:2x2
jax: 0.10.0
libtpu: 0.0.40
codegen_flags: <defaults>
</compile_context>

<pallas_src>
import functools

import jax
import jax.numpy as jnp
from jax.experimental import pallas as pl
from jax.experimental.pallas import tpu as pltpu


LATENT_DIM = 32
ROW_TILE = 2048   # rows (in original [N, F] space) per grid step; sweep 512-2048
LN_EPS = 1e-5     # nn.LayerNorm default


def _round_up(x, m):
    return ((x + m - 1) // m) * m


def _block_diag(w, pack):
    """[f, l] -> block_diag repeated `pack` times: [pack*f, pack*l]."""
    f, l = w.shape
    out = jnp.zeros((pack * f, pack * l), w.dtype)
    for k in range(pack):
        out = out.at[k * f:(k + 1) * f, k * l:(k + 1) * l].set(w)
    return out


def mlp_kernel(x_ref, w1_ref, b1_ref, w2_ref, b2_ref, g_ref, beta_ref, ln_ref,
               o_ref):
    """Two-layer MLP + (grouped) LayerNorm on one lane-packed row tile.

    Shapes (pack = 128 // latent, lanes = pack * latent = 128):
      x_ref    : [P, pack*F]      -- `pack` original rows per packed row
      w1_ref   : [pack*F, lanes]  -- block-diagonal W1
      w2_ref   : [lanes, lanes]   -- block-diagonal W2
      b/g/beta : [1, lanes]       -- per-group tiled bias / gamma / beta
      ln_ref   : [lanes, lanes]   -- per-group averaging matrix (1/latent blocks)
      o_ref    : [P, lanes]       -- lane-dense output (full-width stores)
    All compute in f32.
    """
    x = x_ref[...].astype(jnp.float32)

    # Layer 1: Linear -> SiLU   (MXU matmul + VPU/EUP elementwise)
    h = jnp.dot(x, w1_ref[...], preferred_element_type=jnp.float32) + b1_ref[...]
    h = h * jax.nn.sigmoid(h)

    # Layer 2: Linear
    y = jnp.dot(h, w2_ref[...], preferred_element_type=jnp.float32) + b2_ref[...]

    # LayerNorm over each `latent`-lane group, via the group-averaging matmul
    # (broadcasts each group's mean/var back to its lanes; MXU is idle here).
    mu = jnp.dot(y, ln_ref[...], preferred_element_type=jnp.float32)
    d = y - mu
    var = jnp.dot(d * d, ln_ref[...], preferred_element_type=jnp.float32)
    yhat = d * jax.lax.rsqrt(var + LN_EPS)

    o_ref[...] = (yhat * g_ref[...] + beta_ref[...]).astype(o_ref.dtype)


def mlp_pallas(x, params, *, row_tile=ROW_TILE):
    """Apply the MLP to x of shape [N, F]; returns [N, latent]."""
    w1, b1, w2, b2, gamma, beta = params
    n, f = x.shape
    latent = w1.shape[1]

    # Lane-dense packing factor: pack consecutive rows into the 128-lane axis.
    pack = 128 // latent if (latent <= 128 and 128 % latent == 0) else 1

    # Row-tile alignment: packed blocks need a sublane-multiple of 8 rows.
    align = 8 * pack
    rt = max(align, min(_round_up(row_tile, align), _round_up(n, align)))
    n_pad = _round_up(n, rt)

    x_pad = jnp.pad(x, ((0, n_pad - n), (0, 0))) if n_pad != n else x
    # Free row-major reshape: row i*pack+k's features land in lanes [k*F,(k+1)*F).
    xp = x_pad.reshape(n_pad // pack, pack * f)

    # Resident packed weights (tiny; built on device, constant-folded under jit).
    w1p = _block_diag(w1.astype(jnp.float32), pack)           # [pack*F, lanes]
    w2p = _block_diag(w2.astype(jnp.float32), pack)           # [lanes, lanes]
    b1p = jnp.tile(b1.astype(jnp.float32), (1, pack))
    b2p = jnp.tile(b2.astype(jnp.float32), (1, pack))
    gp = jnp.tile(gamma.astype(jnp.float32), (1, pack))
    bp = jnp.tile(beta.astype(jnp.float32), (1, pack))
    grp = jnp.repeat(jnp.arange(pack), latent)
    lnm = (grp[:, None] == grp[None, :]).astype(jnp.float32) / latent

    lanes = pack * latent
    p_rows = rt // pack                      # packed rows per grid step (mult of 8)
    grid = ((n_pad // pack) // p_rows,)
    full = lambda i: (0, 0)

    out = pl.pallas_call(
        mlp_kernel,
        out_shape=jax.ShapeDtypeStruct((n_pad // pack, lanes), x.dtype),
        grid_spec=pltpu.PrefetchScalarGridSpec(
            num_scalar_prefetch=0,
            grid=grid,
            in_specs=[
                pl.BlockSpec((p_rows, pack * f), lambda i: (i, 0)),  # x tile
                pl.BlockSpec((pack * f, lanes), full),               # W1 (resident)
                pl.BlockSpec((1, lanes), full),                      # b1
                pl.BlockSpec((lanes, lanes), full),                  # W2
                pl.BlockSpec((1, lanes), full),                      # b2
                pl.BlockSpec((1, lanes), full),                      # gamma
                pl.BlockSpec((1, lanes), full),                      # beta
                pl.BlockSpec((lanes, lanes), full),                  # LN group-avg
            ],
            out_specs=pl.BlockSpec((p_rows, lanes), lambda i: (i, 0)),
        ),
        compiler_params=pltpu.CompilerParams(
            dimension_semantics=("parallel",)
        ),
    )(xp, w1p, b1p, w2p, b2p, gp, bp, lnm)

    # Free row-major reshape back to [N, latent]; drop the zero-padded rows.
    out = out.reshape(n_pad, latent)
    return out[:n] if n_pad != n else out


def init_mlp_params(key, in_features, latent_dim, dtype=jnp.float32):
    """Deterministic (keyed) init: small random weights, LN gamma=1 / beta=0."""
    k1, k2 = jax.random.split(key)
    w1 = (jax.random.normal(k1, (in_features, latent_dim), dtype)
          * (1.0 / jnp.sqrt(in_features)))
    b1 = jnp.zeros((1, latent_dim), dtype)
    w2 = (jax.random.normal(k2, (latent_dim, latent_dim), dtype)
          * (1.0 / jnp.sqrt(latent_dim)))
    b2 = jnp.zeros((1, latent_dim), dtype)
    gamma = jnp.ones((1, latent_dim), dtype)
    beta = jnp.zeros((1, latent_dim), dtype)
    return (w1, b1, w2, b2, gamma, beta)


@jax.jit
def _embedder_forward(params, vg, vm, em, eg2m, em2g):
    p_vg, p_vm, p_em, p_g2m, p_m2g = params
    return (mlp_pallas(vg, p_vg),
            mlp_pallas(vm, p_vm),
            mlp_pallas(em, p_em),
            mlp_pallas(eg2m, p_g2m),
            mlp_pallas(em2g, p_m2g))


class EmbedderPallas:
    """Mirrors Embedder.forward: 5 independent MLP embeddings (one jit'ed call)."""

    def __init__(self, key, grid_node_features, embed_feature_latent_dim,
                 mesh_node_features, mesh_edge_features,
                 grid2mesh_edge_features, mesh2grid_edge_features):
        ks = jax.random.split(key, 5)
        L = embed_feature_latent_dim
        self.p_grid_node = init_mlp_params(ks[0], grid_node_features, L)
        self.p_mesh_node = init_mlp_params(ks[1], mesh_node_features, L)
        self.p_mesh_edge = init_mlp_params(ks[2], mesh_edge_features, L)
        self.p_g2m_edge = init_mlp_params(ks[3], grid2mesh_edge_features, L)
        self.p_m2g_edge = init_mlp_params(ks[4], mesh2grid_edge_features, L)

    def __call__(self, vg, vm, em, eg2m, em2g):
        params = (self.p_grid_node, self.p_mesh_node, self.p_mesh_edge,
                  self.p_g2m_edge, self.p_m2g_edge)
        return _embedder_forward(params, vg, vm, em, eg2m, em2g)


def _mlp_ref(x, params):
    """Pure-JAX reference for correctness check."""
    w1, b1, w2, b2, gamma, beta = params
    h = x.astype(jnp.float32) @ w1 + b1
    h = h * jax.nn.sigmoid(h)
    y = h @ w2 + b2
    mu = jnp.mean(y, axis=-1, keepdims=True)
    var = jnp.mean(jnp.square(y - mu), axis=-1, keepdims=True)
    return (y - mu) * jax.lax.rsqrt(var + LN_EPS) * gamma + beta


if __name__ == "__main__":
    key = jax.random.PRNGKey(0)
    k_params, k_vg, k_vm, k_em, k_g2m, k_m2g = jax.random.split(key, 6)

    # Small, forward-consistent shapes: [num_nodes_or_edges, feature_dim]
    grid_node_features = 6
    mesh_node_features = 4
    mesh_edge_features = 5
    grid2mesh_edge_features = 7
    mesh2grid_edge_features = 7
    latent = LATENT_DIM

    vg = jax.random.normal(k_vg, (16, grid_node_features), jnp.float32)
    vm = jax.random.normal(k_vm, (16, mesh_node_features), jnp.float32)
    # 20 is deliberately NOT a multiple of the row tile -> exercises padding path.
    em = jax.random.normal(k_em, (20, mesh_edge_features), jnp.float32)
    eg2m = jax.random.normal(k_g2m, (24, grid2mesh_edge_features), jnp.float32)
    em2g = jax.random.normal(k_m2g, (24, mesh2grid_edge_features), jnp.float32)

    embedder = EmbedderPallas(
        k_params, grid_node_features, latent, mesh_node_features,
        mesh_edge_features, grid2mesh_edge_features, mesh2grid_edge_features)

    outs = embedder(vg, vm, em, eg2m, em2g)
    outs = jax.block_until_ready(outs)

    # Lightweight correctness check against pure-JAX reference.
    refs = (
        _mlp_ref(vg, embedder.p_grid_node),
        _mlp_ref(vm, embedder.p_mesh_node),
        _mlp_ref(em, embedder.p_mesh_edge),
        _mlp_ref(eg2m, embedder.p_g2m_edge),
        _mlp_ref(em2g, embedder.p_m2g_edge),
    )
    for o, r in zip(outs, refs):
        assert o.shape == r.shape
        assert jnp.max(jnp.abs(o - r)) < 1e-4

    print("KERNEL_OK")
</pallas_src>

<mosaic_0001>
module attributes {stable_mosaic.version = 11 : i64} {
  func.func @mlp_kernel(%arg0: i32, %arg1: memref<8x28xf32, #tpu.memory_space<vmem>>, %arg2: memref<28x128xf32, #tpu.memory_space<vmem>>, %arg3: memref<1x128xf32, #tpu.memory_space<vmem>>, %arg4: memref<128x128xf32, #tpu.memory_space<vmem>>, %arg5: memref<1x128xf32, #tpu.memory_space<vmem>>, %arg6: memref<1x128xf32, #tpu.memory_space<vmem>>, %arg7: memref<1x128xf32, #tpu.memory_space<vmem>>, %arg8: memref<128x128xf32, #tpu.memory_space<vmem>>, %arg9: memref<8x128xf32, #tpu.memory_space<vmem>>) attributes {dimension_semantics = [#tpu.dimension_semantics<parallel>], iteration_bounds = array<i64: 1>, scalar_prefetch = 0 : i64, scratch_operands = 0 : i64, tpu.core_type = #tpu.core_type<tc>, window_params = [{transform_indices = @transform_0, window_bounds = array<i64: 8, 28>}, {pipeline_mode = #tpu.pipeline_mode<synchronous>, transform_indices = @transform_1, window_bounds = array<i64: 28, 128>}, {pipeline_mode = #tpu.pipeline_mode<synchronous>, transform_indices = @transform_2, window_bounds = array<i64: 1, 128>}, {pipeline_mode = #tpu.pipeline_mode<synchronous>, transform_indices = @transform_3, window_bounds = array<i64: 128, 128>}, {pipeline_mode = #tpu.pipeline_mode<synchronous>, transform_indices = @transform_4, window_bounds = array<i64: 1, 128>}, {pipeline_mode = #tpu.pipeline_mode<synchronous>, transform_indices = @transform_5, window_bounds = array<i64: 1, 128>}, {pipeline_mode = #tpu.pipeline_mode<synchronous>, transform_indices = @transform_6, window_bounds = array<i64: 1, 128>}, {pipeline_mode = #tpu.pipeline_mode<synchronous>, transform_indices = @transform_7, window_bounds = array<i64: 128, 128>}, {transform_indices = @transform_8, window_bounds = array<i64: 8, 128>}]} {
    %c0 = arith.constant 0 : index
    %c0_0 = arith.constant 0 : index
    %0 = vector.load %arg1[%c0, %c0_0] : memref<8x28xf32, #tpu.memory_space<vmem>>, vector<8x28xf32>
    %c0_1 = arith.constant 0 : index
    %c0_2 = arith.constant 0 : index
    %1 = vector.load %arg2[%c0_1, %c0_2] : memref<28x128xf32, #tpu.memory_space<vmem>>, vector<28x128xf32>
    %cst = arith.constant dense<0.000000e+00> : vector<8x128xf32>
    %2 = tpu.matmul %0, %1, %cst {dimension_numbers = #tpu.dot_dimension_numbers<[1], [0], [0], [1], [0, 0, 1, 1], [], []>} : vector<8x28xf32>, vector<28x128xf32>, vector<8x128xf32> -> vector<8x128xf32>
    %c0_3 = arith.constant 0 : index
    %c0_4 = arith.constant 0 : index
    %3 = vector.load %arg3[%c0_3, %c0_4] : memref<1x128xf32, #tpu.memory_space<vmem>>, vector<1x128xf32>
    %4 = vector.broadcast %3 : vector<1x128xf32> to vector<8x128xf32>
    %5 = arith.addf %2, %4 : vector<8x128xf32>
    %6 = arith.negf %5 : vector<8x128xf32>
    %7 = math.exp %6 : vector<8x128xf32>
    %cst_5 = arith.constant 1.000000e+00 : f32
    %8 = vector.broadcast %cst_5 : f32 to vector<8x128xf32>
    %9 = arith.addf %8, %7 : vector<8x128xf32>
    %10 = arith.divf %8, %9 : vector<8x128xf32>
    %11 = arith.mulf %5, %10 : vector<8x128xf32>
    %c0_6 = arith.constant 0 : index
    %c0_7 = arith.constant 0 : index
    %12 = vector.load %arg4[%c0_6, %c0_7] : memref<128x128xf32, #tpu.memory_space<vmem>>, vector<128x128xf32>
    %cst_8 = arith.constant dense<0.000000e+00> : vector<8x128xf32>
    %13 = tpu.matmul %11, %12, %cst_8 {dimension_numbers = #tpu.dot_dimension_numbers<[1], [0], [0], [1], [0, 0, 1, 1], [], []>} : vector<8x128xf32>, vector<128x128xf32>, vector<8x128xf32> -> vector<8x128xf32>
    %c0_9 = arith.constant 0 : index
    %c0_10 = arith.constant 0 : index
    %14 = vector.load %arg5[%c0_9, %c0_10] : memref<1x128xf32, #tpu.memory_space<vmem>>, vector<1x128xf32>
    %15 = vector.broadcast %14 : vector<1x128xf32> to vector<8x128xf32>
    %16 = arith.addf %13, %15 : vector<8x128xf32>
    %c0_11 = arith.constant 0 : index
    %c0_12 = arith.constant 0 : index
    %17 = vector.load %arg8[%c0_11, %c0_12] : memref<128x128xf32, #tpu.memory_space<vmem>>, vector<128x128xf32>
    %cst_13 = arith.constant dense<0.000000e+00> : vector<8x128xf32>
    %18 = tpu.matmul %16, %17, %cst_13 {dimension_numbers = #tpu.dot_dimension_numbers<[1], [0], [0], [1], [0, 0, 1, 1], [], []>} : vector<8x128xf32>, vector<128x128xf32>, vector<8x128xf32> -> vector<8x128xf32>
    %19 = arith.subf %16, %18 : vector<8x128xf32>
    %20 = arith.mulf %19, %19 : vector<8x128xf32>
    %c0_14 = arith.constant 0 : index
    %c0_15 = arith.constant 0 : index
    %21 = vector.load %arg8[%c0_14, %c0_15] : memref<128x128xf32, #tpu.memory_space<vmem>>, vector<128x128xf32>
    %cst_16 = arith.constant dense<0.000000e+00> : vector<8x128xf32>
    %22 = tpu.matmul %20, %21, %cst_16 {dimension_numbers = #tpu.dot_dimension_numbers<[1], [0], [0], [1], [0, 0, 1, 1], [], []>} : vector<8x128xf32>, vector<128x128xf32>, vector<8x128xf32> -> vector<8x128xf32>
    %cst_17 = arith.constant 9.99999974E-6 : f32
    %23 = vector.broadcast %cst_17 : f32 to vector<8x128xf32>
    %24 = arith.addf %22, %23 : vector<8x128xf32>
    %25 = math.rsqrt %24 : vector<8x128xf32>
    %26 = arith.mulf %19, %25 : vector<8x128xf32>
    %c0_18 = arith.constant 0 : index
    %c0_19 = arith.constant 0 : index
    %27 = vector.load %arg6[%c0_18, %c0_19] : memref<1x128xf32, #tpu.memory_space<vmem>>, vector<1x128xf32>
    %28 = vector.broadcast %27 : vector<1x128xf32> to vector<8x128xf32>
    %29 = arith.mulf %26, %28 : vector<8x128xf32>
    %c0_20 = arith.constant 0 : index
    %c0_21 = arith.constant 0 : index
    %30 = vector.load %arg7[%c0_20, %c0_21] : memref<1x128xf32, #tpu.memory_space<vmem>>, vector<1x128xf32>
    %31 = vector.broadcast %30 : vector<1x128xf32> to vector<8x128xf32>
    %32 = arith.addf %29, %31 : vector<8x128xf32>
    %c0_22 = arith.constant 0 : index
    %c0_23 = arith.constant 0 : index
    %33 = vector.load %arg9[%c0_22, %c0_23] : memref<8x128xf32, #tpu.memory_space<vmem>>, vector<8x128xf32>
    tpu.vector_store %arg9[%c0_22, %c0_23], %32 {strides = array<i32>} : memref<8x128xf32, #tpu.memory_space<vmem>>, vector<8x128xf32>,
    return
  }
  func.func @transform_0(%arg0: i32) -> (i32, i32) {
    %c0_i32 = arith.constant 0 : i32
    %c0_i32_0 = arith.constant 0 : i32
    return %arg0, %c0_i32 : i32, i32
  }
  func.func @transform_1(%arg0: i32) -> (i32, i32) {
    %c0_i32 = arith.constant 0 : i32
    %c0_i32_0 = arith.constant 0 : i32
    %c0_i32_1 = arith.constant 0 : i32
    return %c0_i32, %c0_i32_0 : i32, i32
  }
  func.func @transform_2(%arg0: i32) -> (i32, i32) {
    %c0_i32 = arith.constant 0 : i32
    %c0_i32_0 = arith.constant 0 : i32
    %c0_i32_1 = arith.constant 0 : i32
    return %c0_i32, %c0_i32_0 : i32, i32
  }
  func.func @transform_3(%arg0: i32) -> (i32, i32) {
    %c0_i32 = arith.constant 0 : i32
    %c0_i32_0 = arith.constant 0 : i32
    %c0_i32_1 = arith.constant 0 : i32
    return %c0_i32, %c0_i32_0 : i32, i32
  }
  func.func @transform_4(%arg0: i32) -> (i32, i32) {
    %c0_i32 = arith.constant 0 : i32
    %c0_i32_0 = arith.constant 0 : i32
    %c0_i32_1 = arith.constant 0 : i32
    return %c0_i32, %c0_i32_0 : i32, i32
  }
  func.func @transform_5(%arg0: i32) -> (i32, i32) {
    %c0_i32 = arith.constant 0 : i32
    %c0_i32_0 = arith.constant 0 : i32
    %c0_i32_1 = arith.constant 0 : i32
    return %c0_i32, %c0_i32_0 : i32, i32
  }
  func.func @transform_6(%arg0: i32) -> (i32, i32) {
    %c0_i32 = arith.constant 0 : i32
    %c0_i32_0 = arith.constant 0 : i32
    %c0_i32_1 = arith.constant 0 : i32
    return %c0_i32, %c0_i32_0 : i32, i32
  }
  func.func @transform_7(%arg0: i32) -> (i32, i32) {
    %c0_i32 = arith.constant 0 : i32
    %c0_i32_0 = arith.constant 0 : i32
    %c0_i32_1 = arith.constant 0 : i32
    return %c0_i32, %c0_i32_0 : i32, i32
  }
  func.func @transform_8(%arg0: i32) -> (i32, i32) {
    %c0_i32 = arith.constant 0 : i32
    %c0_i32_0 = arith.constant 0 : i32
    return %arg0, %c0_i32 : i32, i32
  }
}

module attributes {stable_mosaic.version = 11 : i64} {
  func.func @mlp_kernel(%arg0: i32, %arg1: memref<8x20xf32, #tpu.memory_space<vmem>>, %arg2: memref<20x128xf32, #tpu.memory_space<vmem>>, %arg3: memref<1x128xf32, #tpu.memory_space<vmem>>, %arg4: memref<128x128xf32, #tpu.memory_space<vmem>>, %arg5: memref<1x128xf32, #tpu.memory_space<vmem>>, %arg6: memref<1x128xf32, #tpu.memory_space<vmem>>, %arg7: memref<1x128xf32, #tpu.memory_space<vmem>>, %arg8: memref<128x128xf32, #tpu.memory_space<vmem>>, %arg9: memref<8x128xf32, #tpu.memory_space<vmem>>) attributes {dimension_semantics = [#tpu.dimension_semantics<parallel>], iteration_bounds = array<i64: 1>, scalar_prefetch = 0 : i64, scratch_operands = 0 : i64, tpu.core_type = #tpu.core_type<tc>, window_params = [{transform_indices = @transform_0, window_bounds = array<i64: 8, 20>}, {pipeline_mode = #tpu.pipeline_mode<synchronous>, transform_indices = @transform_1, window_bounds = array<i64: 20, 128>}, {pipeline_mode = #tpu.pipeline_mode<synchronous>, transform_indices = @transform_2, window_bounds = array<i64: 1, 128>}, {pipeline_mode = #tpu.pipeline_mode<synchronous>, transform_indices = @transform_3, window_bounds = array<i64: 128, 128>}, {pipeline_mode = #tpu.pipeline_mode<synchronous>, transform_indices = @transform_4, window_bounds = array<i64: 1, 128>}, {pipeline_mode = #tpu.pipeline_mode<synchronous>, transform_indices = @transform_5, window_bounds = array<i64: 1, 128>}, {pipeline_mode = #tpu.pipeline_mode<synchronous>, transform_indices = @transform_6, window_bounds = array<i64: 1, 128>}, {pipeline_mode = #tpu.pipeline_mode<synchronous>, transform_indices = @transform_7, window_bounds = array<i64: 128, 128>}, {transform_indices = @transform_8, window_bounds = array<i64: 8, 128>}]} {
    %c0 = arith.constant 0 : index
    %c0_0 = arith.constant 0 : index
    %0 = vector.load %arg1[%c0, %c0_0] : memref<8x20xf32, #tpu.memory_space<vmem>>, vector<8x20xf32>
    %c0_1 = arith.constant 0 : index
    %c0_2 = arith.constant 0 : index
    %1 = vector.load %arg2[%c0_1, %c0_2] : memref<20x128xf32, #tpu.memory_space<vmem>>, vector<20x128xf32>
    %cst = arith.constant dense<0.000000e+00> : vector<8x128xf32>
    %2 = tpu.matmul %0, %1, %cst {dimension_numbers = #tpu.dot_dimension_numbers<[1], [0], [0], [1], [0, 0, 1, 1], [], []>} : vector<8x20xf32>, vector<20x128xf32>, vector<8x128xf32> -> vector<8x128xf32>
    %c0_3 = arith.constant 0 : index
    %c0_4 = arith.constant 0 : index
    %3 = vector.load %arg3[%c0_3, %c0_4] : memref<1x128xf32, #tpu.memory_space<vmem>>, vector<1x128xf32>
    %4 = vector.broadcast %3 : vector<1x128xf32> to vector<8x128xf32>
    %5 = arith.addf %2, %4 : vector<8x128xf32>
    %6 = arith.negf %5 : vector<8x128xf32>
    %7 = math.exp %6 : vector<8x128xf32>
    %cst_5 = arith.constant 1.000000e+00 : f32
    %8 = vector.broadcast %cst_5 : f32 to vector<8x128xf32>
    %9 = arith.addf %8, %7 : vector<8x128xf32>
    %10 = arith.divf %8, %9 : vector<8x128xf32>
    %11 = arith.mulf %5, %10 : vector<8x128xf32>
    %c0_6 = arith.constant 0 : index
    %c0_7 = arith.constant 0 : index
    %12 = vector.load %arg4[%c0_6, %c0_7] : memref<128x128xf32, #tpu.memory_space<vmem>>, vector<128x128xf32>
    %cst_8 = arith.constant dense<0.000000e+00> : vector<8x128xf32>
    %13 = tpu.matmul %11, %12, %cst_8 {dimension_numbers = #tpu.dot_dimension_numbers<[1], [0], [0], [1], [0, 0, 1, 1], [], []>} : vector<8x128xf32>, vector<128x128xf32>, vector<8x128xf32> -> vector<8x128xf32>
    %c0_9 = arith.constant 0 : index
    %c0_10 = arith.constant 0 : index
    %14 = vector.load %arg5[%c0_9, %c0_10] : memref<1x128xf32, #tpu.memory_space<vmem>>, vector<1x128xf32>
    %15 = vector.broadcast %14 : vector<1x128xf32> to vector<8x128xf32>
    %16 = arith.addf %13, %15 : vector<8x128xf32>
    %c0_11 = arith.constant 0 : index
    %c0_12 = arith.constant 0 : index
    %17 = vector.load %arg8[%c0_11, %c0_12] : memref<128x128xf32, #tpu.memory_space<vmem>>, vector<128x128xf32>
    %cst_13 = arith.constant dense<0.000000e+00> : vector<8x128xf32>
    %18 = tpu.matmul %16, %17, %cst_13 {dimension_numbers = #tpu.dot_dimension_numbers<[1], [0], [0], [1], [0, 0, 1, 1], [], []>} : vector<8x128xf32>, vector<128x128xf32>, vector<8x128xf32> -> vector<8x128xf32>
    %19 = arith.subf %16, %18 : vector<8x128xf32>
    %20 = arith.mulf %19, %19 : vector<8x128xf32>
    %c0_14 = arith.constant 0 : index
    %c0_15 = arith.constant 0 : index
    %21 = vector.load %arg8[%c0_14, %c0_15] : memref<128x128xf32, #tpu.memory_space<vmem>>, vector<128x128xf32>
    %cst_16 = arith.constant dense<0.000000e+00> : vector<8x128xf32>
    %22 = tpu.matmul %20, %21, %cst_16 {dimension_numbers = #tpu.dot_dimension_numbers<[1], [0], [0], [1], [0, 0, 1, 1], [], []>} : vector<8x128xf32>, vector<128x128xf32>, vector<8x128xf32> -> vector<8x128xf32>
    %cst_17 = arith.constant 9.99999974E-6 : f32
    %23 = vector.broadcast %cst_17 : f32 to vector<8x128xf32>
    %24 = arith.addf %22, %23 : vector<8x128xf32>
    %25 = math.rsqrt %24 : vector<8x128xf32>
    %26 = arith.mulf %19, %25 : vector<8x128xf32>
    %c0_18 = arith.constant 0 : index
    %c0_19 = arith.constant 0 : index
    %27 = vector.load %arg6[%c0_18, %c0_19] : memref<1x128xf32, #tpu.memory_space<vmem>>, vector<1x128xf32>
    %28 = vector.broadcast %27 : vector<1x128xf32> to vector<8x128xf32>
    %29 = arith.mulf %26, %28 : vector<8x128xf32>
    %c0_20 = arith.constant 0 : index
    %c0_21 = arith.constant 0 : index
    %30 = vector.load %arg7[%c0_20, %c0_21] : memref<1x128xf32, #tpu.memory_space<vmem>>, vector<1x128xf32>
    %31 = vector.broadcast %30 : vector<1x128xf32> to vector<8x128xf32>
    %32 = arith.addf %29, %31 : vector<8x128xf32>
    %c0_22 = arith.constant 0 : index
    %c0_23 = arith.constant 0 : index
    %33 = vector.load %arg9[%c0_22, %c0_23] : memref<8x128xf32, #tpu.memory_space<vmem>>, vector<8x128xf32>
    tpu.vector_store %arg9[%c0_22, %c0_23], %32 {strides = array<i32>} : memref<8x128xf32, #tpu.memory_space<vmem>>, vector<8x128xf32>,
    return
  }
  func.func @transform_0(%arg0: i32) -> (i32, i32) {
    %c0_i32 = arith.constant 0 : i32
    %c0_i32_0 = arith.constant 0 : i32
    return %arg0, %c0_i32 : i32, i32
  }
  func.func @transform_1(%arg0: i32) -> (i32, i32) {
    %c0_i32 = arith.constant 0 : i32
    %c0_i32_0 = arith.constant 0 : i32
    %c0_i32_1 = arith.constant 0 : i32
    return %c0_i32, %c0_i32_0 : i32, i32
  }
  func.func @transform_2(%arg0: i32) -> (i32, i32) {
    %c0_i32 = arith.constant 0 : i32
    %c0_i32_0 = arith.constant 0 : i32
    %c0_i32_1 = arith.constant 0 : i32
    return %c0_i32, %c0_i32_0 : i32, i32
  }
  func.func @transform_3(%arg0: i32) -> (i32, i32) {
    %c0_i32 = arith.constant 0 : i32
    %c0_i32_0 = arith.constant 0 : i32
    %c0_i32_1 = arith.constant 0 : i32
    return %c0_i32, %c0_i32_0 : i32, i32
  }
  func.func @transform_4(%arg0: i32) -> (i32, i32) {
    %c0_i32 = arith.constant 0 : i32
    %c0_i32_0 = arith.constant 0 : i32
    %c0_i32_1 = arith.constant 0 : i32
    return %c0_i32, %c0_i32_0 : i32, i32
  }
  func.func @transform_5(%arg0: i32) -> (i32, i32) {
    %c0_i32 = arith.constant 0 : i32
    %c0_i32_0 = arith.constant 0 : i32
    %c0_i32_1 = arith.constant 0 : i32
    return %c0_i32, %c0_i32_0 : i32, i32
  }
  func.func @transform_6(%arg0: i32) -> (i32, i32) {
    %c0_i32 = arith.constant 0 : i32
    %c0_i32_0 = arith.constant 0 : i32
    %c0_i32_1 = arith.constant 0 : i32
    return %c0_i32, %c0_i32_0 : i32, i32
  }
  func.func @transform_7(%arg0: i32) -> (i32, i32) {
    %c0_i32 = arith.constant 0 : i32
    %c0_i32_0 = arith.constant 0 : i32
    %c0_i32_1 = arith.constant 0 : i32
    return %c0_i32, %c0_i32_0 : i32, i32
  }
  func.func @transform_8(%arg0: i32) -> (i32, i32) {
    %c0_i32 = arith.constant 0 : i32
    %c0_i32_0 = arith.constant 0 : i32
    return %arg0, %c0_i32 : i32, i32
  }
}

module attributes {stable_mosaic.version = 11 : i64} {
  func.func @mlp_kernel(%arg0: i32, %arg1: memref<8x24xf32, #tpu.memory_space<vmem>>, %arg2: memref<24x128xf32, #tpu.memory_space<vmem>>, %arg3: memref<1x128xf32, #tpu.memory_space<vmem>>, %arg4: memref<128x128xf32, #tpu.memory_space<vmem>>, %arg5: memref<1x128xf32, #tpu.memory_space<vmem>>, %arg6: memref<1x128xf32, #tpu.memory_space<vmem>>, %arg7: memref<1x128xf32, #tpu.memory_space<vmem>>, %arg8: memref<128x128xf32, #tpu.memory_space<vmem>>, %arg9: memref<8x128xf32, #tpu.memory_space<vmem>>) attributes {dimension_semantics = [#tpu.dimension_semantics<parallel>], iteration_bounds = array<i64: 1>, scalar_prefetch = 0 : i64, scratch_operands = 0 : i64, tpu.core_type = #tpu.core_type<tc>, window_params = [{transform_indices = @transform_0, window_bounds = array<i64: 8, 24>}, {pipeline_mode = #tpu.pipeline_mode<synchronous>, transform_indices = @transform_1, window_bounds = array<i64: 24, 128>}, {pipeline_mode = #tpu.pipeline_mode<synchronous>, transform_indices = @transform_2, window_bounds = array<i64: 1, 128>}, {pipeline_mode = #tpu.pipeline_mode<synchronous>, transform_indices = @transform_3, window_bounds = array<i64: 128, 128>}, {pipeline_mode = #tpu.pipeline_mode<synchronous>, transform_indices = @transform_4, window_bounds = array<i64: 1, 128>}, {pipeline_mode = #tpu.pipeline_mode<synchronous>, transform_indices = @transform_5, window_bounds = array<i64: 1, 128>}, {pipeline_mode = #tpu.pipeline_mode<synchronous>, transform_indices = @transform_6, window_bounds = array<i64: 1, 128>}, {pipeline_mode = #tpu.pipeline_mode<synchronous>, transform_indices = @transform_7, window_bounds = array<i64: 128, 128>}, {transform_indices = @transform_8, window_bounds = array<i64: 8, 128>}]} {
    %c0 = arith.constant 0 : index
    %c0_0 = arith.constant 0 : index
    %0 = vector.load %arg1[%c0, %c0_0] : memref<8x24xf32, #tpu.memory_space<vmem>>, vector<8x24xf32>
    %c0_1 = arith.constant 0 : index
    %c0_2 = arith.constant 0 : index
    %1 = vector.load %arg2[%c0_1, %c0_2] : memref<24x128xf32, #tpu.memory_space<vmem>>, vector<24x128xf32>
    %cst = arith.constant dense<0.000000e+00> : vector<8x128xf32>
    %2 = tpu.matmul %0, %1, %cst {dimension_numbers = #tpu.dot_dimension_numbers<[1], [0], [0], [1], [0, 0, 1, 1], [], []>} : vector<8x24xf32>, vector<24x128xf32>, vector<8x128xf32> -> vector<8x128xf32>
    %c0_3 = arith.constant 0 : index
    %c0_4 = arith.constant 0 : index
    %3 = vector.load %arg3[%c0_3, %c0_4] : memref<1x128xf32, #tpu.memory_space<vmem>>, vector<1x128xf32>
    %4 = vector.broadcast %3 : vector<1x128xf32> to vector<8x128xf32>
    %5 = arith.addf %2, %4 : vector<8x128xf32>
    %6 = arith.negf %5 : vector<8x128xf32>
    %7 = math.exp %6 : vector<8x128xf32>
    %cst_5 = arith.constant 1.000000e+00 : f32
    %8 = vector.broadcast %cst_5 : f32 to vector<8x128xf32>
    %9 = arith.addf %8, %7 : vector<8x128xf32>
    %10 = arith.divf %8, %9 : vector<8x128xf32>
    %11 = arith.mulf %5, %10 : vector<8x128xf32>
    %c0_6 = arith.constant 0 : index
    %c0_7 = arith.constant 0 : index
    %12 = vector.load %arg4[%c0_6, %c0_7] : memref<128x128xf32, #tpu.memory_space<vmem>>, vector<128x128xf32>
    %cst_8 = arith.constant dense<0.000000e+00> : vector<8x128xf32>
    %13 = tpu.matmul %11, %12, %cst_8 {dimension_numbers = #tpu.dot_dimension_numbers<[1], [0], [0], [1], [0, 0, 1, 1], [], []>} : vector<8x128xf32>, vector<128x128xf32>, vector<8x128xf32> -> vector<8x128xf32>
    %c0_9 = arith.constant 0 : index
    %c0_10 = arith.constant 0 : index
    %14 = vector.load %arg5[%c0_9, %c0_10] : memref<1x128xf32, #tpu.memory_space<vmem>>, vector<1x128xf32>
    %15 = vector.broadcast %14 : vector<1x128xf32> to vector<8x128xf32>
    %16 = arith.addf %13, %15 : vector<8x128xf32>
    %c0_11 = arith.constant 0 : index
    %c0_12 = arith.constant 0 : index
    %17 = vector.load %arg8[%c0_11, %c0_12] : memref<128x128xf32, #tpu.memory_space<vmem>>, vector<128x128xf32>
    %cst_13 = arith.constant dense<0.000000e+00> : vector<8x128xf32>
    %18 = tpu.matmul %16, %17, %cst_13 {dimension_numbers = #tpu.dot_dimension_numbers<[1], [0], [0], [1], [0, 0, 1, 1], [], []>} : vector<8x128xf32>, vector<128x128xf32>, vector<8x128xf32> -> vector<8x128xf32>
    %19 = arith.subf %16, %18 : vector<8x128xf32>
    %20 = arith.mulf %19, %19 : vector<8x128xf32>
    %c0_14 = arith.constant 0 : index
    %c0_15 = arith.constant 0 : index
    %21 = vector.load %arg8[%c0_14, %c0_15] : memref<128x128xf32, #tpu.memory_space<vmem>>, vector<128x128xf32>
    %cst_16 = arith.constant dense<0.000000e+00> : vector<8x128xf32>
    %22 = tpu.matmul %20, %21, %cst_16 {dimension_numbers = #tpu.dot_dimension_numbers<[1], [0], [0], [1], [0, 0, 1, 1], [], []>} : vector<8x128xf32>, vector<128x128xf32>, vector<8x128xf32> -> vector<8x128xf32>
    %cst_17 = arith.constant 9.99999974E-6 : f32
    %23 = vector.broadcast %cst_17 : f32 to vector<8x128xf32>
    %24 = arith.addf %22, %23 : vector<8x128xf32>
    %25 = math.rsqrt %24 : vector<8x128xf32>
    %26 = arith.mulf %19, %25 : vector<8x128xf32>
    %c0_18 = arith.constant 0 : index
    %c0_19 = arith.constant 0 : index
    %27 = vector.load %arg6[%c0_18, %c0_19] : memref<1x128xf32, #tpu.memory_space<vmem>>, vector<1x128xf32>
    %28 = vector.broadcast %27 : vector<1x128xf32> to vector<8x128xf32>
    %29 = arith.mulf %26, %28 : vector<8x128xf32>
    %c0_20 = arith.constant 0 : index
    %c0_21 = arith.constant 0 : index
    %30 = vector.load %arg7[%c0_20, %c0_21] : memref<1x128xf32, #tpu.memory_space<vmem>>, vector<1x128xf32>
    %31 = vector.broadcast %30 : vector<1x128xf32> to vector<8x128xf32>
    %32 = arith.addf %29, %31 : vector<8x128xf32>
    %c0_22 = arith.constant 0 : index
    %c0_23 = arith.constant 0 : index
    %33 = vector.load %arg9[%c0_22, %c0_23] : memref<8x128xf32, #tpu.memory_space<vmem>>, vector<8x128xf32>
    tpu.vector_store %arg9[%c0_22, %c0_23], %32 {strides = array<i32>} : memref<8x128xf32, #tpu.memory_space<vmem>>, vector<8x128xf32>,
    return
  }
  func.func @transform_0(%arg0: i32) -> (i32, i32) {
    %c0_i32 = arith.constant 0 : i32
    %c0_i32_0 = arith.constant 0 : i32
    return %arg0, %c0_i32 : i32, i32
  }
  func.func @transform_1(%arg0: i32) -> (i32, i32) {
    %c0_i32 = arith.constant 0 : i32
    %c0_i32_0 = arith.constant 0 : i32
    %c0_i32_1 = arith.constant 0 : i32
    return %c0_i32, %c0_i32_0 : i32, i32
  }
  func.func @transform_2(%arg0: i32) -> (i32, i32) {
    %c0_i32 = arith.constant 0 : i32
    %c0_i32_0 = arith.constant 0 : i32
    %c0_i32_1 = arith.constant 0 : i32
    return %c0_i32, %c0_i32_0 : i32, i32
  }
  func.func @transform_3(%arg0: i32) -> (i32, i32) {
    %c0_i32 = arith.constant 0 : i32
    %c0_i32_0 = arith.constant 0 : i32
    %c0_i32_1 = arith.constant 0 : i32
    return %c0_i32, %c0_i32_0 : i32, i32
  }
  func.func @transform_4(%arg0: i32) -> (i32, i32) {
    %c0_i32 = arith.constant 0 : i32
    %c0_i32_0 = arith.constant 0 : i32
    %c0_i32_1 = arith.constant 0 : i32
    return %c0_i32, %c0_i32_0 : i32, i32
  }
  func.func @transform_5(%arg0: i32) -> (i32, i32) {
    %c0_i32 = arith.constant 0 : i32
    %c0_i32_0 = arith.constant 0 : i32
    %c0_i32_1 = arith.constant 0 : i32
    return %c0_i32, %c0_i32_0 : i32, i32
  }
  func.func @transform_6(%arg0: i32) -> (i32, i32) {
    %c0_i32 = arith.constant 0 : i32
    %c0_i32_0 = arith.constant 0 : i32
    %c0_i32_1 = arith.constant 0 : i32
    return %c0_i32, %c0_i32_0 : i32, i32
  }
  func.func @transform_7(%arg0: i32) -> (i32, i32) {
    %c0_i32 = arith.constant 0 : i32
    %c0_i32_0 = arith.constant 0 : i32
    %c0_i32_1 = arith.constant 0 : i32
    return %c0_i32, %c0_i32_0 : i32, i32
  }
  func.func @transform_8(%arg0: i32) -> (i32, i32) {
    %c0_i32 = arith.constant 0 : i32
    %c0_i32_0 = arith.constant 0 : i32
    return %arg0, %c0_i32 : i32, i32
  }
}

module attributes {stable_mosaic.version = 11 : i64} {
  func.func @mlp_kernel(%arg0: i32, %arg1: memref<8x16xf32, #tpu.memory_space<vmem>>, %arg2: memref<16x128xf32, #tpu.memory_space<vmem>>, %arg3: memref<1x128xf32, #tpu.memory_space<vmem>>, %arg4: memref<128x128xf32, #tpu.memory_space<vmem>>, %arg5: memref<1x128xf32, #tpu.memory_space<vmem>>, %arg6: memref<1x128xf32, #tpu.memory_space<vmem>>, %arg7: memref<1x128xf32, #tpu.memory_space<vmem>>, %arg8: memref<128x128xf32, #tpu.memory_space<vmem>>, %arg9: memref<8x128xf32, #tpu.memory_space<vmem>>) attributes {dimension_semantics = [#tpu.dimension_semantics<parallel>], iteration_bounds = array<i64: 1>, scalar_prefetch = 0 : i64, scratch_operands = 0 : i64, tpu.core_type = #tpu.core_type<tc>, window_params = [{transform_indices = @transform_0, window_bounds = array<i64: 8, 16>}, {pipeline_mode = #tpu.pipeline_mode<synchronous>, transform_indices = @transform_1, window_bounds = array<i64: 16, 128>}, {pipeline_mode = #tpu.pipeline_mode<synchronous>, transform_indices = @transform_2, window_bounds = array<i64: 1, 128>}, {pipeline_mode = #tpu.pipeline_mode<synchronous>, transform_indices = @transform_3, window_bounds = array<i64: 128, 128>}, {pipeline_mode = #tpu.pipeline_mode<synchronous>, transform_indices = @transform_4, window_bounds = array<i64: 1, 128>}, {pipeline_mode = #tpu.pipeline_mode<synchronous>, transform_indices = @transform_5, window_bounds = array<i64: 1, 128>}, {pipeline_mode = #tpu.pipeline_mode<synchronous>, transform_indices = @transform_6, window_bounds = array<i64: 1, 128>}, {pipeline_mode = #tpu.pipeline_mode<synchronous>, transform_indices = @transform_7, window_bounds = array<i64: 128, 128>}, {transform_indices = @transform_8, window_bounds = array<i64: 8, 128>}]} {
    %c0 = arith.constant 0 : index
    %c0_0 = arith.constant 0 : index
    %0 = vector.load %arg1[%c0, %c0_0] : memref<8x16xf32, #tpu.memory_space<vmem>>, vector<8x16xf32>
    %c0_1 = arith.constant 0 : index
    %c0_2 = arith.constant 0 : index
    %1 = vector.load %arg2[%c0_1, %c0_2] : memref<16x128xf32, #tpu.memory_space<vmem>>, vector<16x128xf32>
    %cst = arith.constant dense<0.000000e+00> : vector<8x128xf32>
    %2 = tpu.matmul %0, %1, %cst {dimension_numbers = #tpu.dot_dimension_numbers<[1], [0], [0], [1], [0, 0, 1, 1], [], []>} : vector<8x16xf32>, vector<16x128xf32>, vector<8x128xf32> -> vector<8x128xf32>
    %c0_3 = arith.constant 0 : index
    %c0_4 = arith.constant 0 : index
    %3 = vector.load %arg3[%c0_3, %c0_4] : memref<1x128xf32, #tpu.memory_space<vmem>>, vector<1x128xf32>
    %4 = vector.broadcast %3 : vector<1x128xf32> to vector<8x128xf32>
    %5 = arith.addf %2, %4 : vector<8x128xf32>
    %6 = arith.negf %5 : vector<8x128xf32>
    %7 = math.exp %6 : vector<8x128xf32>
    %cst_5 = arith.constant 1.000000e+00 : f32
    %8 = vector.broadcast %cst_5 : f32 to vector<8x128xf32>
    %9 = arith.addf %8, %7 : vector<8x128xf32>
    %10 = arith.divf %8, %9 : vector<8x128xf32>
    %11 = arith.mulf %5, %10 : vector<8x128xf32>
    %c0_6 = arith.constant 0 : index
    %c0_7 = arith.constant 0 : index
    %12 = vector.load %arg4[%c0_6, %c0_7] : memref<128x128xf32, #tpu.memory_space<vmem>>, vector<128x128xf32>
    %cst_8 = arith.constant dense<0.000000e+00> : vector<8x128xf32>
    %13 = tpu.matmul %11, %12, %cst_8 {dimension_numbers = #tpu.dot_dimension_numbers<[1], [0], [0], [1], [0, 0, 1, 1], [], []>} : vector<8x128xf32>, vector<128x128xf32>, vector<8x128xf32> -> vector<8x128xf32>
    %c0_9 = arith.constant 0 : index
    %c0_10 = arith.constant 0 : index
    %14 = vector.load %arg5[%c0_9, %c0_10] : memref<1x128xf32, #tpu.memory_space<vmem>>, vector<1x128xf32>
    %15 = vector.broadcast %14 : vector<1x128xf32> to vector<8x128xf32>
    %16 = arith.addf %13, %15 : vector<8x128xf32>
    %c0_11 = arith.constant 0 : index
    %c0_12 = arith.constant 0 : index
    %17 = vector.load %arg8[%c0_11, %c0_12] : memref<128x128xf32, #tpu.memory_space<vmem>>, vector<128x128xf32>
    %cst_13 = arith.constant dense<0.000000e+00> : vector<8x128xf32>
    %18 = tpu.matmul %16, %17, %cst_13 {dimension_numbers = #tpu.dot_dimension_numbers<[1], [0], [0], [1], [0, 0, 1, 1], [], []>} : vector<8x128xf32>, vector<128x128xf32>, vector<8x128xf32> -> vector<8x128xf32>
    %19 = arith.subf %16, %18 : vector<8x128xf32>
    %20 = arith.mulf %19, %19 : vector<8x128xf32>
    %c0_14 = arith.constant 0 : index
    %c0_15 = arith.constant 0 : index
    %21 = vector.load %arg8[%c0_14, %c0_15] : memref<128x128xf32, #tpu.memory_space<vmem>>, vector<128x128xf32>
    %cst_16 = arith.constant dense<0.000000e+00> : vector<8x128xf32>
    %22 = tpu.matmul %20, %21, %cst_16 {dimension_numbers = #tpu.dot_dimension_numbers<[1], [0], [0], [1], [0, 0, 1, 1], [], []>} : vector<8x128xf32>, vector<128x128xf32>, vector<8x128xf32> -> vector<8x128xf32>
    %cst_17 = arith.constant 9.99999974E-6 : f32
    %23 = vector.broadcast %cst_17 : f32 to vector<8x128xf32>
    %24 = arith.addf %22, %23 : vector<8x128xf32>
    %25 = math.rsqrt %24 : vector<8x128xf32>
    %26 = arith.mulf %19, %25 : vector<8x128xf32>
    %c0_18 = arith.constant 0 : index
    %c0_19 = arith.constant 0 : index
    %27 = vector.load %arg6[%c0_18, %c0_19] : memref<1x128xf32, #tpu.memory_space<vmem>>, vector<1x128xf32>
    %28 = vector.broadcast %27 : vector<1x128xf32> to vector<8x128xf32>
    %29 = arith.mulf %26, %28 : vector<8x128xf32>
    %c0_20 = arith.constant 0 : index
    %c0_21 = arith.constant 0 : index
    %30 = vector.load %arg7[%c0_20, %c0_21] : memref<1x128xf32, #tpu.memory_space<vmem>>, vector<1x128xf32>
    %31 = vector.broadcast %30 : vector<1x128xf32> to vector<8x128xf32>
    %32 = arith.addf %29, %31 : vector<8x128xf32>
    %c0_22 = arith.constant 0 : index
    %c0_23 = arith.constant 0 : index
    %33 = vector.load %arg9[%c0_22, %c0_23] : memref<8x128xf32, #tpu.memory_space<vmem>>, vector<8x128xf32>
    tpu.vector_store %arg9[%c0_22, %c0_23], %32 {strides = array<i32>} : memref<8x128xf32, #tpu.memory_space<vmem>>, vector<8x128xf32>,
    return
  }
  func.func @transform_0(%arg0: i32) -> (i32, i32) {
    %c0_i32 = arith.constant 0 : i32
    %c0_i32_0 = arith.constant 0 : i32
    return %arg0, %c0_i32 : i32, i32
  }
  func.func @transform_1(%arg0: i32) -> (i32, i32) {
    %c0_i32 = arith.constant 0 : i32
    %c0_i32_0 = arith.constant 0 : i32
    %c0_i32_1 = arith.constant 0 : i32
    return %c0_i32, %c0_i32_0 : i32, i32
  }
  func.func @transform_2(%arg0: i32) -> (i32, i32) {
    %c0_i32 = arith.constant 0 : i32
    %c0_i32_0 = arith.constant 0 : i32
    %c0_i32_1 = arith.constant 0 : i32
    return %c0_i32, %c0_i32_0 : i32, i32
  }
  func.func @transform_3(%arg0: i32) -> (i32, i32) {
    %c0_i32 = arith.constant 0 : i32
    %c0_i32_0 = arith.constant 0 : i32
    %c0_i32_1 = arith.constant 0 : i32
    return %c0_i32, %c0_i32_0 : i32, i32
  }
  func.func @transform_4(%arg0: i32) -> (i32, i32) {
    %c0_i32 = arith.constant 0 : i32
    %c0_i32_0 = arith.constant 0 : i32
    %c0_i32_1 = arith.constant 0 : i32
    return %c0_i32, %c0_i32_0 : i32, i32
  }
  func.func @transform_5(%arg0: i32) -> (i32, i32) {
    %c0_i32 = arith.constant 0 : i32
    %c0_i32_0 = arith.constant 0 : i32
    %c0_i32_1 = arith.constant 0 : i32
    return %c0_i32, %c0_i32_0 : i32, i32
  }
  func.func @transform_6(%arg0: i32) -> (i32, i32) {
    %c0_i32 = arith.constant 0 : i32
    %c0_i32_0 = arith.constant 0 : i32
    %c0_i32_1 = arith.constant 0 : i32
    return %c0_i32, %c0_i32_0 : i32, i32
  }
  func.func @transform_7(%arg0: i32) -> (i32, i32) {
    %c0_i32 = arith.constant 0 : i32
    %c0_i32_0 = arith.constant 0 : i32
    %c0_i32_1 = arith.constant 0 : i32
    return %c0_i32, %c0_i32_0 : i32, i32
  }
  func.func @transform_8(%arg0: i32) -> (i32, i32) {
    %c0_i32 = arith.constant 0 : i32
    %c0_i32_0 = arith.constant 0 : i32
    return %arg0, %c0_i32 : i32, i32
  }
}

</mosaic_0001>

<bundles_post_ra>
// kernel: eq.36
= control target key start
LH: loop header
LB: loop body
LE: loop exit
PB: predicated region body
PF: predicated region fallthrough
CT: control target
= control target key end

     0   :  { %s37_s8 = smov 32   ;;  %s38_s9 = smov 64   ;;  %vm7_vm0 = vcmask 261120   ;;  %vm13_vm1 = vcmask 1048320   ;;  %vm19_vm2 = vcmask 785920   ;;  %vm25_vm3 = vcmask 523520   ;;  %s55_s0 = inlined_call_operand.vmem [shape: s32[4,32], index: 0, kind: input, shape index: {}]   ;;  %s56_s1 = inlined_call_operand.vmem [shape: s32[128], index: 1, kind: output, shape index: {}]  }
   0x1   :  { %v4_v0 = vld [vmem:[%s55_s0] sm:$0xf]  ;;  %s36_s0 = smov 96  }
   0x2   :  { %5 = vst [vmem:[#allocation1] sm:$0xf] %v4_v0 }
   0x9   :  { %v10_v1 = vld [vmem:[#allocation1 + $0x3] sm:$0x1]   ;;  %v22_v2 = vld [vmem:[#allocation1 + $0x1] sm:$0x1]   ;;  %v16_v3 = vld [vmem:[#allocation1 + $0x2] sm:$0x1]  }
   0xa   :  { %11 = vrot.lane.b32.xlu0 %v10_v1, %s36_s0  ;;  %23 = vrot.lane.b32.xlu1 %v22_v2, %s37_s8  ;;  %v6_v4 = vld [vmem:[#allocation1] sm:$0x1]  }
   0xb   :  { %8 = vst.msk [vmem:[#allocation0] sm:$0x1] %vm7_vm0, %v6_v4  }
  0x12   :  { %17 = vrot.lane.b32.xlu0 %v16_v3, %s38_s9 }
  0x7c   :  { %v12_v5 = vpop.permute.xlu0 %11   ;;  %v24_v6 = vpop.permute.xlu1 %23  }
  0x7d   :  { %14 = vst.msk [vmem:[#allocation0] sm:$0x1] %vm13_vm1, %v12_v5  }
  0x84   :  { %v18_v7 = vpop.permute.xlu0 %17  }
  0x85   :  { %20 = vst.msk [vmem:[#allocation0] sm:$0x1] %vm19_vm2, %v18_v7  }
  0x86   :  { %26 = vst.msk [vmem:[#allocation0] sm:$0x1] %vm25_vm3, %v24_v6  }
  0x8d   :  { %v29_v8 = vld [vmem:[#allocation0] sm:$0x1] }
  0x8e   :  { %32 = vst [vmem:[%s56_s1] sm:$0x1] %v29_v8 }

// kernel: _embedder_forward.8
= control target key start
LH: loop header
LB: loop body
LE: loop exit
PB: predicated region body
PF: predicated region fallthrough
CT: control target
= control target key end

     0   :  { %vm42_vm0 = vcmask 1043456   ;;  %vm38_vm1 = vcmask 228352   ;;  %s398_s1 = inlined_call_operand.vmem [shape: f32[28,128], index: 1, kind: input, shape index: {}]   ;;  %s399_s2 = inlined_call_operand.vmem [shape: f32[1,128], index: 2, kind: input, shape index: {}]   ;;  %s400_s0 = inlined_call_operand.vmem [shape: f32[8,28], index: 0, kind: input, shape index: {}]   ;;  %s401_s4 = inlined_call_operand.vmem [shape: f32[1,128], index: 4, kind: input, shape index: {}]   ;;  %s402_s3 = inlined_call_operand.vmem [shape: f32[128,128], index: 3, kind: input, shape index: {}]   ;;  %s403_s7 = inlined_call_operand.vmem [shape: f32[128,128], index: 7, kind: input, shape index: {}]   ;;  %s404_s5 = inlined_call_operand.vmem [shape: f32[1,128], index: 5, kind: input, shape index: {}]   ;;  %s405_s6 = inlined_call_operand.vmem [shape: f32[1,128], index: 6, kind: input, shape index: {}]   ;;  %s406_s8 = inlined_call_operand.vmem [shape: f32[8,128], index: 8, kind: output, shape index: {}]  }
   0x1   :  { %v33_v0 = vld [vmem:[%s398_s1 + $0x18] sm:$0xf]  ;;  %v32_v1 = vld [vmem:[%s398_s1 + $0x10] sm:$0xff]  ;;  %v31_v2 = vld [vmem:[%s398_s1 + $0x8] sm:$0xff] }
   0x2   :  { %210 = vmatpush.msk.msra.mxu0 %vm42_vm0, %v33_v0  ;;  %v30_v3 = vld [vmem:[%s398_s1] sm:$0xff]  ;;  %v101_v5 = vld [vmem:[%s402_s3 + $0x78] sm:$0xff]  ;;  %v100_v6 = vld [vmem:[%s402_s3 + $0x70] sm:$0xff] }
   0x3   :  { %v29_v4 = vld [vmem:[%s400_s0] sm:$0xff]  ;;  %106 = vmatpush.msra.mxu1 %v101_v5  ;;  %v99_v7 = vld [vmem:[%s402_s3 + $0x68] sm:$0xff]  ;;  %v97_v9 = vld [vmem:[%s402_s3 + $0x58] sm:$0xff] }
   0x4   :  { %59 = vmatpush.msra.mxu0 %v32_v1  ;;  %v98_v8 = vld [vmem:[%s402_s3 + $0x60] sm:$0xff]  ;;  %v96_v10 = vld [vmem:[%s402_s3 + $0x50] sm:$0xff]  ;;  %v95_v11 = vld [vmem:[%s402_s3 + $0x48] sm:$0xff] }
   0x5   :  { %107 = vmatpush.msra.mxu1 %v100_v6  ;;  %v94_v12 = vld [vmem:[%s402_s3 + $0x40] sm:$0xff]  ;;  %v93_v13 = vld [vmem:[%s402_s3 + $0x38] sm:$0xff]  ;;  %v92_v14 = vld [vmem:[%s402_s3 + $0x30] sm:$0xff] }
   0x6   :  { %60 = vmatpush.msra.mxu0 %v31_v2  ;;  %v91_v15 = vld [vmem:[%s402_s3 + $0x28] sm:$0xff]  ;;  %v90_v16 = vld [vmem:[%s402_s3 + $0x20] sm:$0xff]  ;;  %v89_v17 = vld [vmem:[%s402_s3 + $0x18] sm:$0xff] }
   0x7   :  { %108 = vmatpush.msra.mxu1 %v99_v7  ;;  %v88_v18 = vld [vmem:[%s402_s3 + $0x10] sm:$0xff]  ;;  %v87_v19 = vld [vmem:[%s402_s3 + $0x8] sm:$0xff]  ;;  %v213_v20 = vld [vmem:[%s399_s2] ss:$0 sm:$0xff] }
   0x8   :  { %61 = vmatpush.msra.mxu0 %v30_v3  ;;  %v86_v21 = vld [vmem:[%s402_s3] sm:$0xff]  ;;  %v141_v24 = vld [vmem:[%s403_s7 + $0x78] sm:$0xff]  ;;  %v140_v25 = vld [vmem:[%s403_s7 + $0x70] sm:$0xff] }
   0x9   :  { %211 = vmatmul.msk.f32.vlgmr.msra.gmra.mxu0 %vm38_vm1, %v29_v4  ;;  %109 = vmatpush.msra.mxu1 %v98_v8  ;;  %v139_v27 = vld [vmem:[%s403_s7 + $0x68] sm:$0xff]  ;;  %v138_v28 = vld [vmem:[%s403_s7 + $0x60] sm:$0xff]  ;;  %v137_v29 = vld [vmem:[%s403_s7 + $0x58] sm:$0xff] }
   0xa   :  { %142 = vmatpush.msra.mxu2 %v141_v24  ;;  %164 = vmatpush.msra.mxu3 %v141_v24  ;;  %v136_v30 = vld [vmem:[%s403_s7 + $0x50] sm:$0xff]  ;;  %v135_v32 = vld [vmem:[%s403_s7 + $0x48] sm:$0xff]  ;;  %v134_v34 = vld [vmem:[%s403_s7 + $0x40] sm:$0xff] }
   0xb   :  { %110 = vmatpush.msra.mxu1 %v97_v9  ;;  %v133_v35 = vld [vmem:[%s403_s7 + $0x38] sm:$0xff]  ;;  %v132_v36 = vld [vmem:[%s403_s7 + $0x30] sm:$0xff]  ;;  %v131_v37 = vld [vmem:[%s403_s7 + $0x28] sm:$0xff] }
   0xc   :  { %143 = vmatpush.msra.mxu2 %v140_v25  ;;  %165 = vmatpush.msra.mxu3 %v140_v25  ;;  %v130_v40 = vld [vmem:[%s403_s7 + $0x20] sm:$0xff]  ;;  %v129_v42 = vld [vmem:[%s403_s7 + $0x18] sm:$0xff]  ;;  %v128_v46 = vld [vmem:[%s403_s7 + $0x10] sm:$0xff] }
   0xd   :  { %111 = vmatpush.msra.mxu1 %v96_v10  ;;  %v127_v52 = vld [vmem:[%s403_s7 + $0x8] sm:$0xff]  ;;  %v126_v53 = vld [vmem:[%s403_s7] sm:$0xff] }
   0xe   :  { %144 = vmatpush.msra.mxu2 %v139_v27  ;;  %166 = vmatpush.msra.mxu3 %v139_v27  ;;  %v214_v54 = vld [vmem:[%s401_s4] ss:$0 sm:$0xff] }
   0xf   :  { %112 = vmatpush.msra.mxu1 %v95_v11  ;;  %v215_v4 = vld [vmem:[%s404_s5] ss:$0 sm:$0xff] }
  0x10   :  { %145 = vmatpush.msra.mxu2 %v138_v28  ;;  %167 = vmatpush.msra.mxu3 %v138_v28  ;;  %v216_v7 = vld [vmem:[%s405_s6] ss:$0 sm:$0xff] }
  0x11   :  { %113 = vmatpush.msra.mxu1 %v94_v12 }
  0x12   :  { %146 = vmatpush.msra.mxu2 %v137_v29  ;;  %168 = vmatpush.msra.mxu3 %v137_v29 }
  0x13   :  { %114 = vmatpush.msra.mxu1 %v93_v13 }
  0x14   :  { %147 = vmatpush.msra.mxu2 %v136_v30  ;;  %169 = vmatpush.msra.mxu3 %v136_v30 }
  0x15   :  { %115 = vmatpush.msra.mxu1 %v92_v14 }
  0x16   :  { %148 = vmatpush.msra.mxu2 %v135_v32  ;;  %170 = vmatpush.msra.mxu3 %v135_v32 }
  0x17   :  { %116 = vmatpush.msra.mxu1 %v91_v15 }
  0x18   :  { %149 = vmatpush.msra.mxu2 %v134_v34  ;;  %171 = vmatpush.msra.mxu3 %v134_v34 }
  0x19   :  { %117 = vmatpush.msra.mxu1 %v90_v16 }
  0x1a   :  { %150 = vmatpush.msra.mxu2 %v133_v35  ;;  %172 = vmatpush.msra.mxu3 %v133_v35 }
  0x1b   :  { %118 = vmatpush.msra.mxu1 %v89_v17 }
  0x1c   :  { %151 = vmatpush.msra.mxu2 %v132_v36  ;;  %173 = vmatpush.msra.mxu3 %v132_v36 }
  0x1d   :  { %119 = vmatpush.msra.mxu1 %v88_v18 }
  0x1e   :  { %152 = vmatpush.msra.mxu2 %v131_v37  ;;  %174 = vmatpush.msra.mxu3 %v131_v37 }
  0x1f   :  { %120 = vmatpush.msra.mxu1 %v87_v19 }
  0x20   :  { %153 = vmatpush.msra.mxu2 %v130_v40  ;;  %175 = vmatpush.msra.mxu3 %v130_v40 }
  0x21   :  { %121 = vmatpush.msra.mxu1 %v86_v21 }
  0x22   :  { %154 = vmatpush.msra.mxu2 %v129_v42  ;;  %176 = vmatpush.msra.mxu3 %v129_v42 }
  0x24   :  { %155 = vmatpush.msra.mxu2 %v128_v46  ;;  %177 = vmatpush.msra.mxu3 %v128_v46 }
  0x26   :  { %156 = vmatpush.msra.mxu2 %v127_v52  ;;  %178 = vmatpush.msra.mxu3 %v127_v52 }
  0x28   :  { %157 = vmatpush.msra.mxu2 %v126_v53  ;;  %179 = vmatpush.msra.mxu3 %v126_v53 }
  0x86   :  { %v63_v22 = vpop.f32.mrf.mxu0 }
  0x87   :  { %v334_v23 = vadd.f32 %v213_v20, %v63_v22 }
  0x89   :  { %v212_v26 = vmul.f32 -1.442695, %v334_v23 }
  0x8b   :  { %217 = vpow2.f32 %v212_v26 }
  0x91   :  { %v218_v31 = vpop.eup %217 }
  0x92   :  { %v69_v33 = vadd.f32 1.0, %v218_v31 }
  0x94   :  { %219 = vrcp.f32 %v69_v33  ;;  %v81_v43 = vand.u32 2147483648, %v69_v33  ;;  %v79_v45 = vand.u32 2147483647, %v69_v33  ;;  %vm75_vm3 = vweird.f32 %v69_v33 }
  0x96   :  { %v82_v48 = vor.u32 1.1754944e-38, %v81_v43  ;;  %vm80_vm5 = vcmp.eq.f32.partialorder %v79_v45, 8.507059e+37 }
  0x9a   :  { %v220_v38 = vpop.eup %219 }
  0x9b   :  { %v71_v39 = vmul.f32 %v220_v38, %v69_v33  ;;  %vm76_vm2 = vweird.f32 %v220_v38 }
  0x9c   :  { %vm77_vm4 = vmor %vm75_vm3, %vm76_vm2 }
  0x9d   :  { %v72_v41 = vsub.f32 1.0, %v71_v39 }
  0x9f   :  { %v73_v44 = vmul.f32 %v220_v38, %v72_v41 }
  0xa1   :  { %v74_v47 = vadd.f32 %v220_v38, %v73_v44 }
  0xa3   :  { %v78_v49 = vsel %vm77_vm4, %v220_v38, %v74_v47 }
  0xa4   :  { %v83_v50 = vsel %vm80_vm5, %v82_v48, %v78_v49 }
  0xa5   :  { %v85_v51 = vmul.f32 %v83_v50, %v334_v23 }
  0xa7   :  { %122 = vmatmul.f32.vlgmr.msra.gmra.mxu1 %v85_v51 }
 0x124   :  { %v123_v55 = vpop.f32.mrf.mxu1 }
 0x125   :  { %v124_v56 = vadd.f32 %v214_v54, %v123_v55 }
 0x127   :  { %158 = vmatmul.f32.vlgmr.msra.gmra.mxu2 %v124_v56 }
 0x1aa   :  { %v159_v57 = vpop.f32.mrf.mxu2 }
 0x1ab   :  { %v162_v58 = vsub.f32 %v124_v56, %v159_v57 }
 0x1ad   :  { %v163_v59 = vmul.f32 %v162_v58, %v162_v58 }
 0x1af   :  { %180 = vmatmul.f32.vlgmr.msra.gmra.mxu3 %v163_v59 }
 0x232   :  { %v181_v60 = vpop.f32.mrf.mxu3 }
 0x233   :  { %v182_v61 = vadd.f32 1e-05, %v181_v60 }
 0x235   :  { %221 = vrsqrt.f32 %v182_v61  ;;  %vm190_vm7 = vweird.f32 %v182_v61 }
 0x23b   :  { %v222_v62 = vpop.eup %221 }
 0x23c   :  { %v185_v63 = vmul.f32 %v222_v62, %v182_v61  ;;  %vm191_vm6 = vweird.f32 %v222_v62 }
 0x23d   :  { %vm192_vm8 = vmor %vm190_vm7, %vm191_vm6 }
 0x23e   :  { %v186_v0 = vmul.f32 %v222_v62, %v185_v63 }
 0x240   :  { %v187_v1 = vmul.f32 0.5, %v186_v0 }
 0x242   :  { %v188_v2 = vsub.f32 1.5, %v187_v1 }
 0x244   :  { %v189_v3 = vmul.f32 %v222_v62, %v188_v2 }
 0x246   :  { %v193_v5 = vsel %vm192_vm8, %v222_v62, %v189_v3 }
 0x247   :  { %v194_v6 = vmul.f32 %v193_v5, %v162_v58 }
 0x249   :  { %v199_v8 = vmul.f32 %v215_v4, %v194_v6 }
 0x24b   :  { %v204_v9 = vadd.f32 %v216_v7, %v199_v8 }
 0x24d   :  { %205 = vst [vmem:[%s406_s8] sm:$0xff] %v204_v9 }

// kernel: _embedder_forward.7
= control target key start
LH: loop header
LB: loop body
LE: loop exit
PB: predicated region body
PF: predicated region fallthrough
CT: control target
= control target key end

     0   :  { %vm41_vm0 = vcmask 1043456   ;;  %vm37_vm1 = vcmask 162816   ;;  %s394_s1 = inlined_call_operand.vmem [shape: f32[20,128], index: 1, kind: input, shape index: {}]   ;;  %s395_s0 = inlined_call_operand.vmem [shape: f32[8,20], index: 0, kind: input, shape index: {}]   ;;  %s396_s2 = inlined_call_operand.vmem [shape: f32[1,128], index: 2, kind: input, shape index: {}]   ;;  %s397_s4 = inlined_call_operand.vmem [shape: f32[1,128], index: 4, kind: input, shape index: {}]   ;;  %s398_s3 = inlined_call_operand.vmem [shape: f32[128,128], index: 3, kind: input, shape index: {}]   ;;  %s399_s7 = inlined_call_operand.vmem [shape: f32[128,128], index: 7, kind: input, shape index: {}]   ;;  %s400_s5 = inlined_call_operand.vmem [shape: f32[1,128], index: 5, kind: input, shape index: {}]   ;;  %s401_s6 = inlined_call_operand.vmem [shape: f32[1,128], index: 6, kind: input, shape index: {}]   ;;  %s402_s8 = inlined_call_operand.vmem [shape: f32[8,128], index: 8, kind: output, shape index: {}]  }
   0x1   :  { %v32_v0 = vld [vmem:[%s394_s1 + $0x10] sm:$0xf]  ;;  %v31_v1 = vld [vmem:[%s394_s1 + $0x8] sm:$0xff]  ;;  %v30_v2 = vld [vmem:[%s394_s1] sm:$0xff] }
   0x2   :  { %209 = vmatpush.msk.msra.mxu0 %vm41_vm0, %v32_v0  ;;  %v29_v3 = vld [vmem:[%s395_s0] sm:$0xff]  ;;  %v100_v4 = vld [vmem:[%s398_s3 + $0x78] sm:$0xff]  ;;  %v99_v5 = vld [vmem:[%s398_s3 + $0x70] sm:$0xff] }
   0x3   :  { %105 = vmatpush.msra.mxu1 %v100_v4  ;;  %v98_v6 = vld [vmem:[%s398_s3 + $0x68] sm:$0xff]  ;;  %v97_v7 = vld [vmem:[%s398_s3 + $0x60] sm:$0xff]  ;;  %v96_v8 = vld [vmem:[%s398_s3 + $0x58] sm:$0xff] }
   0x4   :  { %59 = vmatpush.msra.mxu0 %v31_v1  ;;  %v95_v9 = vld [vmem:[%s398_s3 + $0x50] sm:$0xff]  ;;  %v94_v10 = vld [vmem:[%s398_s3 + $0x48] sm:$0xff]  ;;  %v93_v11 = vld [vmem:[%s398_s3 + $0x40] sm:$0xff] }
   0x5   :  { %106 = vmatpush.msra.mxu1 %v99_v5  ;;  %v92_v12 = vld [vmem:[%s398_s3 + $0x38] sm:$0xff]  ;;  %v91_v13 = vld [vmem:[%s398_s3 + $0x30] sm:$0xff]  ;;  %v90_v14 = vld [vmem:[%s398_s3 + $0x28] sm:$0xff] }
   0x6   :  { %60 = vmatpush.msra.mxu0 %v30_v2  ;;  %v89_v15 = vld [vmem:[%s398_s3 + $0x20] sm:$0xff]  ;;  %v88_v16 = vld [vmem:[%s398_s3 + $0x18] sm:$0xff]  ;;  %v87_v17 = vld [vmem:[%s398_s3 + $0x10] sm:$0xff] }
   0x7   :  { %210 = vmatmul.msk.f32.vlgmr.msra.gmra.mxu0 %vm37_vm1, %v29_v3  ;;  %107 = vmatpush.msra.mxu1 %v98_v6  ;;  %v86_v18 = vld [vmem:[%s398_s3 + $0x8] sm:$0xff]  ;;  %v212_v19 = vld [vmem:[%s396_s2] ss:$0 sm:$0xff]  ;;  %v140_v23 = vld [vmem:[%s399_s7 + $0x78] sm:$0xff] }
   0x8   :  { %v85_v20 = vld [vmem:[%s398_s3] sm:$0xff]  ;;  %v139_v24 = vld [vmem:[%s399_s7 + $0x70] sm:$0xff]  ;;  %141 = vmatpush.msra.mxu2 %v140_v23  ;;  %163 = vmatpush.msra.mxu3 %v140_v23  ;;  %v138_v26 = vld [vmem:[%s399_s7 + $0x68] sm:$0xff] }
   0x9   :  { %108 = vmatpush.msra.mxu1 %v97_v7  ;;  %v137_v27 = vld [vmem:[%s399_s7 + $0x60] sm:$0xff]  ;;  %v136_v28 = vld [vmem:[%s399_s7 + $0x58] sm:$0xff]  ;;  %v135_v29 = vld [vmem:[%s399_s7 + $0x50] sm:$0xff] }
   0xa   :  { %142 = vmatpush.msra.mxu2 %v139_v24  ;;  %164 = vmatpush.msra.mxu3 %v139_v24  ;;  %v134_v31 = vld [vmem:[%s399_s7 + $0x48] sm:$0xff]  ;;  %v133_v33 = vld [vmem:[%s399_s7 + $0x40] sm:$0xff]  ;;  %v132_v34 = vld [vmem:[%s399_s7 + $0x38] sm:$0xff] }
   0xb   :  { %109 = vmatpush.msra.mxu1 %v96_v8  ;;  %v131_v35 = vld [vmem:[%s399_s7 + $0x30] sm:$0xff]  ;;  %v130_v36 = vld [vmem:[%s399_s7 + $0x28] sm:$0xff]  ;;  %v129_v39 = vld [vmem:[%s399_s7 + $0x20] sm:$0xff] }
   0xc   :  { %143 = vmatpush.msra.mxu2 %v138_v26  ;;  %165 = vmatpush.msra.mxu3 %v138_v26  ;;  %v128_v41 = vld [vmem:[%s399_s7 + $0x18] sm:$0xff]  ;;  %v127_v45 = vld [vmem:[%s399_s7 + $0x10] sm:$0xff]  ;;  %v126_v51 = vld [vmem:[%s399_s7 + $0x8] sm:$0xff] }
   0xd   :  { %110 = vmatpush.msra.mxu1 %v95_v9  ;;  %v125_v52 = vld [vmem:[%s399_s7] sm:$0xff] }
   0xe   :  { %144 = vmatpush.msra.mxu2 %v137_v27  ;;  %166 = vmatpush.msra.mxu3 %v137_v27  ;;  %v213_v53 = vld [vmem:[%s397_s4] ss:$0 sm:$0xff] }
   0xf   :  { %111 = vmatpush.msra.mxu1 %v94_v10  ;;  %v214_v3 = vld [vmem:[%s400_s5] ss:$0 sm:$0xff] }
  0x10   :  { %145 = vmatpush.msra.mxu2 %v136_v28  ;;  %167 = vmatpush.msra.mxu3 %v136_v28  ;;  %v215_v6 = vld [vmem:[%s401_s6] ss:$0 sm:$0xff] }
  0x11   :  { %112 = vmatpush.msra.mxu1 %v93_v11 }
  0x12   :  { %146 = vmatpush.msra.mxu2 %v135_v29  ;;  %168 = vmatpush.msra.mxu3 %v135_v29 }
  0x13   :  { %113 = vmatpush.msra.mxu1 %v92_v12 }
  0x14   :  { %147 = vmatpush.msra.mxu2 %v134_v31  ;;  %169 = vmatpush.msra.mxu3 %v134_v31 }
  0x15   :  { %114 = vmatpush.msra.mxu1 %v91_v13 }
  0x16   :  { %148 = vmatpush.msra.mxu2 %v133_v33  ;;  %170 = vmatpush.msra.mxu3 %v133_v33 }
  0x17   :  { %115 = vmatpush.msra.mxu1 %v90_v14 }
  0x18   :  { %149 = vmatpush.msra.mxu2 %v132_v34  ;;  %171 = vmatpush.msra.mxu3 %v132_v34 }
  0x19   :  { %116 = vmatpush.msra.mxu1 %v89_v15 }
  0x1a   :  { %150 = vmatpush.msra.mxu2 %v131_v35  ;;  %172 = vmatpush.msra.mxu3 %v131_v35 }
  0x1b   :  { %117 = vmatpush.msra.mxu1 %v88_v16 }
  0x1c   :  { %151 = vmatpush.msra.mxu2 %v130_v36  ;;  %173 = vmatpush.msra.mxu3 %v130_v36 }
  0x1d   :  { %118 = vmatpush.msra.mxu1 %v87_v17 }
  0x1e   :  { %152 = vmatpush.msra.mxu2 %v129_v39  ;;  %174 = vmatpush.msra.mxu3 %v129_v39 }
  0x1f   :  { %119 = vmatpush.msra.mxu1 %v86_v18 }
  0x20   :  { %153 = vmatpush.msra.mxu2 %v128_v41  ;;  %175 = vmatpush.msra.mxu3 %v128_v41 }
  0x21   :  { %120 = vmatpush.msra.mxu1 %v85_v20 }
  0x22   :  { %154 = vmatpush.msra.mxu2 %v127_v45  ;;  %176 = vmatpush.msra.mxu3 %v127_v45 }
  0x24   :  { %155 = vmatpush.msra.mxu2 %v126_v51  ;;  %177 = vmatpush.msra.mxu3 %v126_v51 }
  0x26   :  { %156 = vmatpush.msra.mxu2 %v125_v52  ;;  %178 = vmatpush.msra.mxu3 %v125_v52 }
  0x84   :  { %v62_v21 = vpop.f32.mrf.mxu0 }
  0x85   :  { %v330_v22 = vadd.f32 %v212_v19, %v62_v21 }
  0x87   :  { %v211_v25 = vmul.f32 -1.442695, %v330_v22 }
  0x89   :  { %216 = vpow2.f32 %v211_v25 }
  0x8f   :  { %v217_v30 = vpop.eup %216 }
  0x90   :  { %v68_v32 = vadd.f32 1.0, %v217_v30 }
  0x92   :  { %218 = vrcp.f32 %v68_v32  ;;  %v80_v42 = vand.u32 2147483648, %v68_v32  ;;  %v78_v44 = vand.u32 2147483647, %v68_v32  ;;  %vm74_vm3 = vweird.f32 %v68_v32 }
  0x94   :  { %v81_v47 = vor.u32 1.1754944e-38, %v80_v42  ;;  %vm79_vm5 = vcmp.eq.f32.partialorder %v78_v44, 8.507059e+37 }
  0x98   :  { %v219_v37 = vpop.eup %218 }
  0x99   :  { %v70_v38 = vmul.f32 %v219_v37, %v68_v32  ;;  %vm75_vm2 = vweird.f32 %v219_v37 }
  0x9a   :  { %vm76_vm4 = vmor %vm74_vm3, %vm75_vm2 }
  0x9b   :  { %v71_v40 = vsub.f32 1.0, %v70_v38 }
  0x9d   :  { %v72_v43 = vmul.f32 %v219_v37, %v71_v40 }
  0x9f   :  { %v73_v46 = vadd.f32 %v219_v37, %v72_v43 }
  0xa1   :  { %v77_v48 = vsel %vm76_vm4, %v219_v37, %v73_v46 }
  0xa2   :  { %v82_v49 = vsel %vm79_vm5, %v81_v47, %v77_v48 }
  0xa3   :  { %v84_v50 = vmul.f32 %v82_v49, %v330_v22 }
  0xa5   :  { %121 = vmatmul.f32.vlgmr.msra.gmra.mxu1 %v84_v50 }
 0x122   :  { %v122_v54 = vpop.f32.mrf.mxu1 }
 0x123   :  { %v123_v55 = vadd.f32 %v213_v53, %v122_v54 }
 0x125   :  { %157 = vmatmul.f32.vlgmr.msra.gmra.mxu2 %v123_v55 }
 0x1a8   :  { %v158_v56 = vpop.f32.mrf.mxu2 }
 0x1a9   :  { %v161_v57 = vsub.f32 %v123_v55, %v158_v56 }
 0x1ab   :  { %v162_v58 = vmul.f32 %v161_v57, %v161_v57 }
 0x1ad   :  { %179 = vmatmul.f32.vlgmr.msra.gmra.mxu3 %v162_v58 }
 0x230   :  { %v180_v59 = vpop.f32.mrf.mxu3 }
 0x231   :  { %v181_v60 = vadd.f32 1e-05, %v180_v59 }
 0x233   :  { %220 = vrsqrt.f32 %v181_v60  ;;  %vm189_vm7 = vweird.f32 %v181_v60 }
 0x239   :  { %v221_v61 = vpop.eup %220 }
 0x23a   :  { %v184_v62 = vmul.f32 %v221_v61, %v181_v60  ;;  %vm190_vm6 = vweird.f32 %v221_v61 }
 0x23b   :  { %vm191_vm8 = vmor %vm189_vm7, %vm190_vm6 }
 0x23c   :  { %v185_v63 = vmul.f32 %v221_v61, %v184_v62 }
 0x23e   :  { %v186_v0 = vmul.f32 0.5, %v185_v63 }
 0x240   :  { %v187_v1 = vsub.f32 1.5, %v186_v0 }
 0x242   :  { %v188_v2 = vmul.f32 %v221_v61, %v187_v1 }
 0x244   :  { %v192_v4 = vsel %vm191_vm8, %v221_v61, %v188_v2 }
 0x245   :  { %v193_v5 = vmul.f32 %v192_v4, %v161_v57 }
 0x247   :  { %v198_v7 = vmul.f32 %v214_v3, %v193_v5 }
 0x249   :  { %v203_v8 = vadd.f32 %v215_v6, %v198_v7 }
 0x24b   :  { %204 = vst [vmem:[%s402_s8] sm:$0xff] %v203_v8 }

// kernel: _embedder_forward.5
= control target key start
LH: loop header
LB: loop body
LE: loop exit
PB: predicated region body
PF: predicated region fallthrough
CT: control target
= control target key end

     0   :  { %vm37_vm0 = vcmask 195584   ;;  %s389_s1 = inlined_call_operand.vmem [shape: f32[24,128], index: 1, kind: input, shape index: {}]   ;;  %s390_s0 = inlined_call_operand.vmem [shape: f32[8,24], index: 0, kind: input, shape index: {}]   ;;  %s391_s2 = inlined_call_operand.vmem [shape: f32[1,128], index: 2, kind: input, shape index: {}]   ;;  %s392_s4 = inlined_call_operand.vmem [shape: f32[1,128], index: 4, kind: input, shape index: {}]   ;;  %s393_s3 = inlined_call_operand.vmem [shape: f32[128,128], index: 3, kind: input, shape index: {}]   ;;  %s394_s7 = inlined_call_operand.vmem [shape: f32[128,128], index: 7, kind: input, shape index: {}]   ;;  %s395_s5 = inlined_call_operand.vmem [shape: f32[1,128], index: 5, kind: input, shape index: {}]   ;;  %s396_s6 = inlined_call_operand.vmem [shape: f32[1,128], index: 6, kind: input, shape index: {}]   ;;  %s397_s8 = inlined_call_operand.vmem [shape: f32[8,128], index: 8, kind: output, shape index: {}]  }
   0x1   :  { %v32_v0 = vld [vmem:[%s389_s1 + $0x10] sm:$0xff]  ;;  %v31_v1 = vld [vmem:[%s389_s1 + $0x8] sm:$0xff]  ;;  %v30_v2 = vld [vmem:[%s389_s1] sm:$0xff] }
   0x2   :  { %54 = vmatpush.msra.mxu0 %v32_v0  ;;  %v29_v3 = vld [vmem:[%s390_s0] sm:$0xff]  ;;  %v96_v4 = vld [vmem:[%s393_s3 + $0x78] sm:$0xff]  ;;  %v95_v5 = vld [vmem:[%s393_s3 + $0x70] sm:$0xff] }
   0x3   :  { %101 = vmatpush.msra.mxu1 %v96_v4  ;;  %v94_v6 = vld [vmem:[%s393_s3 + $0x68] sm:$0xff]  ;;  %v93_v7 = vld [vmem:[%s393_s3 + $0x60] sm:$0xff]  ;;  %v92_v8 = vld [vmem:[%s393_s3 + $0x58] sm:$0xff] }
   0x4   :  { %55 = vmatpush.msra.mxu0 %v31_v1  ;;  %v91_v9 = vld [vmem:[%s393_s3 + $0x50] sm:$0xff]  ;;  %v90_v10 = vld [vmem:[%s393_s3 + $0x48] sm:$0xff]  ;;  %v89_v11 = vld [vmem:[%s393_s3 + $0x40] sm:$0xff] }
   0x5   :  { %102 = vmatpush.msra.mxu1 %v95_v5  ;;  %v88_v12 = vld [vmem:[%s393_s3 + $0x38] sm:$0xff]  ;;  %v87_v13 = vld [vmem:[%s393_s3 + $0x30] sm:$0xff]  ;;  %v86_v14 = vld [vmem:[%s393_s3 + $0x28] sm:$0xff] }
   0x6   :  { %56 = vmatpush.msra.mxu0 %v30_v2  ;;  %v85_v15 = vld [vmem:[%s393_s3 + $0x20] sm:$0xff]  ;;  %v84_v16 = vld [vmem:[%s393_s3 + $0x18] sm:$0xff]  ;;  %v83_v17 = vld [vmem:[%s393_s3 + $0x10] sm:$0xff] }
   0x7   :  { %205 = vmatmul.msk.f32.vlgmr.msra.gmra.mxu0 %vm37_vm0, %v29_v3  ;;  %103 = vmatpush.msra.mxu1 %v94_v6  ;;  %v82_v18 = vld [vmem:[%s393_s3 + $0x8] sm:$0xff]  ;;  %v207_v19 = vld [vmem:[%s391_s2] ss:$0 sm:$0xff]  ;;  %v136_v23 = vld [vmem:[%s394_s7 + $0x78] sm:$0xff] }
   0x8   :  { %v81_v20 = vld [vmem:[%s393_s3] sm:$0xff]  ;;  %v135_v24 = vld [vmem:[%s394_s7 + $0x70] sm:$0xff]  ;;  %137 = vmatpush.msra.mxu2 %v136_v23  ;;  %159 = vmatpush.msra.mxu3 %v136_v23  ;;  %v134_v26 = vld [vmem:[%s394_s7 + $0x68] sm:$0xff] }
   0x9   :  { %104 = vmatpush.msra.mxu1 %v93_v7  ;;  %v133_v27 = vld [vmem:[%s394_s7 + $0x60] sm:$0xff]  ;;  %v132_v28 = vld [vmem:[%s394_s7 + $0x58] sm:$0xff]  ;;  %v131_v29 = vld [vmem:[%s394_s7 + $0x50] sm:$0xff] }
   0xa   :  { %138 = vmatpush.msra.mxu2 %v135_v24  ;;  %160 = vmatpush.msra.mxu3 %v135_v24  ;;  %v130_v31 = vld [vmem:[%s394_s7 + $0x48] sm:$0xff]  ;;  %v129_v33 = vld [vmem:[%s394_s7 + $0x40] sm:$0xff]  ;;  %v128_v34 = vld [vmem:[%s394_s7 + $0x38] sm:$0xff] }
   0xb   :  { %105 = vmatpush.msra.mxu1 %v92_v8  ;;  %v127_v35 = vld [vmem:[%s394_s7 + $0x30] sm:$0xff]  ;;  %v126_v36 = vld [vmem:[%s394_s7 + $0x28] sm:$0xff]  ;;  %v125_v39 = vld [vmem:[%s394_s7 + $0x20] sm:$0xff] }
   0xc   :  { %139 = vmatpush.msra.mxu2 %v134_v26  ;;  %161 = vmatpush.msra.mxu3 %v134_v26  ;;  %v124_v41 = vld [vmem:[%s394_s7 + $0x18] sm:$0xff]  ;;  %v123_v45 = vld [vmem:[%s394_s7 + $0x10] sm:$0xff]  ;;  %v122_v51 = vld [vmem:[%s394_s7 + $0x8] sm:$0xff] }
   0xd   :  { %106 = vmatpush.msra.mxu1 %v91_v9  ;;  %v121_v52 = vld [vmem:[%s394_s7] sm:$0xff] }
   0xe   :  { %140 = vmatpush.msra.mxu2 %v133_v27  ;;  %162 = vmatpush.msra.mxu3 %v133_v27  ;;  %v208_v53 = vld [vmem:[%s392_s4] ss:$0 sm:$0xff] }
   0xf   :  { %107 = vmatpush.msra.mxu1 %v90_v10  ;;  %v209_v3 = vld [vmem:[%s395_s5] ss:$0 sm:$0xff] }
  0x10   :  { %141 = vmatpush.msra.mxu2 %v132_v28  ;;  %163 = vmatpush.msra.mxu3 %v132_v28  ;;  %v210_v6 = vld [vmem:[%s396_s6] ss:$0 sm:$0xff] }
  0x11   :  { %108 = vmatpush.msra.mxu1 %v89_v11 }
  0x12   :  { %142 = vmatpush.msra.mxu2 %v131_v29  ;;  %164 = vmatpush.msra.mxu3 %v131_v29 }
  0x13   :  { %109 = vmatpush.msra.mxu1 %v88_v12 }
  0x14   :  { %143 = vmatpush.msra.mxu2 %v130_v31  ;;  %165 = vmatpush.msra.mxu3 %v130_v31 }
  0x15   :  { %110 = vmatpush.msra.mxu1 %v87_v13 }
  0x16   :  { %144 = vmatpush.msra.mxu2 %v129_v33  ;;  %166 = vmatpush.msra.mxu3 %v129_v33 }
  0x17   :  { %111 = vmatpush.msra.mxu1 %v86_v14 }
  0x18   :  { %145 = vmatpush.msra.mxu2 %v128_v34  ;;  %167 = vmatpush.msra.mxu3 %v128_v34 }
  0x19   :  { %112 = vmatpush.msra.mxu1 %v85_v15 }
  0x1a   :  { %146 = vmatpush.msra.mxu2 %v127_v35  ;;  %168 = vmatpush.msra.mxu3 %v127_v35 }
  0x1b   :  { %113 = vmatpush.msra.mxu1 %v84_v16 }
  0x1c   :  { %147 = vmatpush.msra.mxu2 %v126_v36  ;;  %169 = vmatpush.msra.mxu3 %v126_v36 }
  0x1d   :  { %114 = vmatpush.msra.mxu1 %v83_v17 }
  0x1e   :  { %148 = vmatpush.msra.mxu2 %v125_v39  ;;  %170 = vmatpush.msra.mxu3 %v125_v39 }
  0x1f   :  { %115 = vmatpush.msra.mxu1 %v82_v18 }
  0x20   :  { %149 = vmatpush.msra.mxu2 %v124_v41  ;;  %171 = vmatpush.msra.mxu3 %v124_v41 }
  0x21   :  { %116 = vmatpush.msra.mxu1 %v81_v20 }
  0x22   :  { %150 = vmatpush.msra.mxu2 %v123_v45  ;;  %172 = vmatpush.msra.mxu3 %v123_v45 }
  0x24   :  { %151 = vmatpush.msra.mxu2 %v122_v51  ;;  %173 = vmatpush.msra.mxu3 %v122_v51 }
  0x26   :  { %152 = vmatpush.msra.mxu2 %v121_v52  ;;  %174 = vmatpush.msra.mxu3 %v121_v52 }
  0x84   :  { %v58_v21 = vpop.f32.mrf.mxu0 }
  0x85   :  { %v325_v22 = vadd.f32 %v207_v19, %v58_v21 }
  0x87   :  { %v206_v25 = vmul.f32 -1.442695, %v325_v22 }
  0x89   :  { %211 = vpow2.f32 %v206_v25 }
  0x8f   :  { %v212_v30 = vpop.eup %211 }
  0x90   :  { %v64_v32 = vadd.f32 1.0, %v212_v30 }
  0x92   :  { %213 = vrcp.f32 %v64_v32  ;;  %v76_v42 = vand.u32 2147483648, %v64_v32  ;;  %v74_v44 = vand.u32 2147483647, %v64_v32  ;;  %vm70_vm2 = vweird.f32 %v64_v32 }
  0x94   :  { %v77_v47 = vor.u32 1.1754944e-38, %v76_v42  ;;  %vm75_vm4 = vcmp.eq.f32.partialorder %v74_v44, 8.507059e+37 }
  0x98   :  { %v214_v37 = vpop.eup %213 }
  0x99   :  { %v66_v38 = vmul.f32 %v214_v37, %v64_v32  ;;  %vm71_vm1 = vweird.f32 %v214_v37 }
  0x9a   :  { %vm72_vm3 = vmor %vm70_vm2, %vm71_vm1 }
  0x9b   :  { %v67_v40 = vsub.f32 1.0, %v66_v38 }
  0x9d   :  { %v68_v43 = vmul.f32 %v214_v37, %v67_v40 }
  0x9f   :  { %v69_v46 = vadd.f32 %v214_v37, %v68_v43 }
  0xa1   :  { %v73_v48 = vsel %vm72_vm3, %v214_v37, %v69_v46 }
  0xa2   :  { %v78_v49 = vsel %vm75_vm4, %v77_v47, %v73_v48 }
  0xa3   :  { %v80_v50 = vmul.f32 %v78_v49, %v325_v22 }
  0xa5   :  { %117 = vmatmul.f32.vlgmr.msra.gmra.mxu1 %v80_v50 }
 0x122   :  { %v118_v54 = vpop.f32.mrf.mxu1 }
 0x123   :  { %v119_v55 = vadd.f32 %v208_v53, %v118_v54 }
 0x125   :  { %153 = vmatmul.f32.vlgmr.msra.gmra.mxu2 %v119_v55 }
 0x1a8   :  { %v154_v56 = vpop.f32.mrf.mxu2 }
 0x1a9   :  { %v157_v57 = vsub.f32 %v119_v55, %v154_v56 }
 0x1ab   :  { %v158_v58 = vmul.f32 %v157_v57, %v157_v57 }
 0x1ad   :  { %175 = vmatmul.f32.vlgmr.msra.gmra.mxu3 %v158_v58 }
 0x230   :  { %v176_v59 = vpop.f32.mrf.mxu3 }
 0x231   :  { %v177_v60 = vadd.f32 1e-05, %v176_v59 }
 0x233   :  { %215 = vrsqrt.f32 %v177_v60  ;;  %vm185_vm6 = vweird.f32 %v177_v60 }
 0x239   :  { %v216_v61 = vpop.eup %215 }
 0x23a   :  { %v180_v62 = vmul.f32 %v216_v61, %v177_v60  ;;  %vm186_vm5 = vweird.f32 %v216_v61 }
 0x23b   :  { %vm187_vm7 = vmor %vm185_vm6, %vm186_vm5 }
 0x23c   :  { %v181_v63 = vmul.f32 %v216_v61, %v180_v62 }
 0x23e   :  { %v182_v0 = vmul.f32 0.5, %v181_v63 }
 0x240   :  { %v183_v1 = vsub.f32 1.5, %v182_v0 }
 0x242   :  { %v184_v2 = vmul.f32 %v216_v61, %v183_v1 }
 0x244   :  { %v188_v4 = vsel %vm187_vm7, %v216_v61, %v184_v2 }
 0x245   :  { %v189_v5 = vmul.f32 %v188_v4, %v157_v57 }
 0x247   :  { %v194_v7 = vmul.f32 %v209_v3, %v189_v5 }
 0x249   :  { %v199_v8 = vadd.f32 %v210_v6, %v194_v7 }
 0x24b   :  { %200 = vst [vmem:[%s397_s8] sm:$0xff] %v199_v8 }

// kernel: _embedder_forward.6
= control target key start
LH: loop header
LB: loop body
LE: loop exit
PB: predicated region body
PF: predicated region fallthrough
CT: control target
= control target key end

     0   :  { %vm36_vm0 = vcmask 130048   ;;  %s385_s1 = inlined_call_operand.vmem [shape: f32[16,128], index: 1, kind: input, shape index: {}]   ;;  %s386_s0 = inlined_call_operand.vmem [shape: f32[8,16], index: 0, kind: input, shape index: {}]   ;;  %s387_s2 = inlined_call_operand.vmem [shape: f32[1,128], index: 2, kind: input, shape index: {}]   ;;  %s388_s4 = inlined_call_operand.vmem [shape: f32[1,128], index: 4, kind: input, shape index: {}]   ;;  %s389_s3 = inlined_call_operand.vmem [shape: f32[128,128], index: 3, kind: input, shape index: {}]   ;;  %s390_s7 = inlined_call_operand.vmem [shape: f32[128,128], index: 7, kind: input, shape index: {}]   ;;  %s391_s5 = inlined_call_operand.vmem [shape: f32[1,128], index: 5, kind: input, shape index: {}]   ;;  %s392_s6 = inlined_call_operand.vmem [shape: f32[1,128], index: 6, kind: input, shape index: {}]   ;;  %s393_s8 = inlined_call_operand.vmem [shape: f32[8,128], index: 8, kind: output, shape index: {}]  }
   0x1   :  { %v31_v0 = vld [vmem:[%s385_s1 + $0x8] sm:$0xff]  ;;  %v30_v1 = vld [vmem:[%s385_s1] sm:$0xff]  ;;  %v95_v3 = vld [vmem:[%s389_s3 + $0x78] sm:$0xff] }
   0x2   :  { %54 = vmatpush.msra.mxu0 %v31_v0  ;;  %v29_v2 = vld [vmem:[%s386_s0] sm:$0xff]  ;;  %100 = vmatpush.msra.mxu1 %v95_v3  ;;  %v94_v4 = vld [vmem:[%s389_s3 + $0x70] sm:$0xff]  ;;  %v93_v5 = vld [vmem:[%s389_s3 + $0x68] sm:$0xff] }
   0x3   :  { %v92_v6 = vld [vmem:[%s389_s3 + $0x60] sm:$0xff]  ;;  %v91_v7 = vld [vmem:[%s389_s3 + $0x58] sm:$0xff]  ;;  %v90_v8 = vld [vmem:[%s389_s3 + $0x50] sm:$0xff] }
   0x4   :  { %55 = vmatpush.msra.mxu0 %v30_v1  ;;  %101 = vmatpush.msra.mxu1 %v94_v4  ;;  %v89_v9 = vld [vmem:[%s389_s3 + $0x48] sm:$0xff]  ;;  %v88_v10 = vld [vmem:[%s389_s3 + $0x40] sm:$0xff]  ;;  %v87_v11 = vld [vmem:[%s389_s3 + $0x38] sm:$0xff] }
   0x5   :  { %204 = vmatmul.msk.f32.vlgmr.msra.gmra.mxu0 %vm36_vm0, %v29_v2  ;;  %v86_v12 = vld [vmem:[%s389_s3 + $0x30] sm:$0xff]  ;;  %v85_v13 = vld [vmem:[%s389_s3 + $0x28] sm:$0xff]  ;;  %v84_v14 = vld [vmem:[%s389_s3 + $0x20] sm:$0xff] }
   0x6   :  { %102 = vmatpush.msra.mxu1 %v93_v5  ;;  %v83_v15 = vld [vmem:[%s389_s3 + $0x18] sm:$0xff]  ;;  %v82_v16 = vld [vmem:[%s389_s3 + $0x10] sm:$0xff]  ;;  %v81_v17 = vld [vmem:[%s389_s3 + $0x8] sm:$0xff] }
   0x7   :  { %v206_v18 = vld [vmem:[%s387_s2] ss:$0 sm:$0xff]  ;;  %v135_v22 = vld [vmem:[%s390_s7 + $0x78] sm:$0xff]  ;;  %v134_v23 = vld [vmem:[%s390_s7 + $0x70] sm:$0xff] }
   0x8   :  { %103 = vmatpush.msra.mxu1 %v92_v6  ;;  %v80_v19 = vld [vmem:[%s389_s3] sm:$0xff]  ;;  %136 = vmatpush.msra.mxu2 %v135_v22  ;;  %v133_v25 = vld [vmem:[%s390_s7 + $0x68] sm:$0xff]  ;;  %v131_v27 = vld [vmem:[%s390_s7 + $0x58] sm:$0xff] }
   0x9   :  { %158 = vmatpush.msra.mxu3 %v135_v22  ;;  %v132_v26 = vld [vmem:[%s390_s7 + $0x60] sm:$0xff]  ;;  %v130_v28 = vld [vmem:[%s390_s7 + $0x50] sm:$0xff]  ;;  %v129_v30 = vld [vmem:[%s390_s7 + $0x48] sm:$0xff] }
   0xa   :  { %104 = vmatpush.msra.mxu1 %v91_v7  ;;  %137 = vmatpush.msra.mxu2 %v134_v23  ;;  %v128_v32 = vld [vmem:[%s390_s7 + $0x40] sm:$0xff]  ;;  %v127_v33 = vld [vmem:[%s390_s7 + $0x38] sm:$0xff]  ;;  %v126_v34 = vld [vmem:[%s390_s7 + $0x30] sm:$0xff] }
   0xb   :  { %159 = vmatpush.msra.mxu3 %v134_v23  ;;  %v125_v35 = vld [vmem:[%s390_s7 + $0x28] sm:$0xff]  ;;  %v124_v38 = vld [vmem:[%s390_s7 + $0x20] sm:$0xff]  ;;  %v123_v40 = vld [vmem:[%s390_s7 + $0x18] sm:$0xff] }
   0xc   :  { %105 = vmatpush.msra.mxu1 %v90_v8  ;;  %138 = vmatpush.msra.mxu2 %v133_v25  ;;  %v122_v44 = vld [vmem:[%s390_s7 + $0x10] sm:$0xff]  ;;  %v121_v50 = vld [vmem:[%s390_s7 + $0x8] sm:$0xff]  ;;  %v120_v51 = vld [vmem:[%s390_s7] sm:$0xff] }
   0xd   :  { %160 = vmatpush.msra.mxu3 %v133_v25  ;;  %v207_v52 = vld [vmem:[%s388_s4] ss:$0 sm:$0xff] }
   0xe   :  { %106 = vmatpush.msra.mxu1 %v89_v9  ;;  %139 = vmatpush.msra.mxu2 %v132_v26  ;;  %v208_v2 = vld [vmem:[%s391_s5] ss:$0 sm:$0xff] }
   0xf   :  { %161 = vmatpush.msra.mxu3 %v132_v26  ;;  %v209_v5 = vld [vmem:[%s392_s6] ss:$0 sm:$0xff] }
  0x10   :  { %107 = vmatpush.msra.mxu1 %v88_v10  ;;  %140 = vmatpush.msra.mxu2 %v131_v27 }
  0x11   :  { %162 = vmatpush.msra.mxu3 %v131_v27 }
  0x12   :  { %108 = vmatpush.msra.mxu1 %v87_v11  ;;  %141 = vmatpush.msra.mxu2 %v130_v28 }
  0x13   :  { %163 = vmatpush.msra.mxu3 %v130_v28 }
  0x14   :  { %109 = vmatpush.msra.mxu1 %v86_v12  ;;  %142 = vmatpush.msra.mxu2 %v129_v30 }
  0x15   :  { %164 = vmatpush.msra.mxu3 %v129_v30 }
  0x16   :  { %110 = vmatpush.msra.mxu1 %v85_v13  ;;  %143 = vmatpush.msra.mxu2 %v128_v32 }
  0x17   :  { %165 = vmatpush.msra.mxu3 %v128_v32 }
  0x18   :  { %111 = vmatpush.msra.mxu1 %v84_v14  ;;  %144 = vmatpush.msra.mxu2 %v127_v33 }
  0x19   :  { %166 = vmatpush.msra.mxu3 %v127_v33 }
  0x1a   :  { %112 = vmatpush.msra.mxu1 %v83_v15  ;;  %145 = vmatpush.msra.mxu2 %v126_v34 }
  0x1b   :  { %167 = vmatpush.msra.mxu3 %v126_v34 }
  0x1c   :  { %113 = vmatpush.msra.mxu1 %v82_v16  ;;  %146 = vmatpush.msra.mxu2 %v125_v35 }
  0x1d   :  { %168 = vmatpush.msra.mxu3 %v125_v35 }
  0x1e   :  { %114 = vmatpush.msra.mxu1 %v81_v17  ;;  %147 = vmatpush.msra.mxu2 %v124_v38 }
  0x1f   :  { %169 = vmatpush.msra.mxu3 %v124_v38 }
  0x20   :  { %115 = vmatpush.msra.mxu1 %v80_v19  ;;  %148 = vmatpush.msra.mxu2 %v123_v40 }
  0x21   :  { %170 = vmatpush.msra.mxu3 %v123_v40 }
  0x22   :  { %149 = vmatpush.msra.mxu2 %v122_v44 }
  0x23   :  { %171 = vmatpush.msra.mxu3 %v122_v44 }
  0x24   :  { %150 = vmatpush.msra.mxu2 %v121_v50 }
  0x25   :  { %172 = vmatpush.msra.mxu3 %v121_v50 }
  0x26   :  { %151 = vmatpush.msra.mxu2 %v120_v51 }
  0x27   :  { %173 = vmatpush.msra.mxu3 %v120_v51 }
  0x82   :  { %v57_v20 = vpop.f32.mrf.mxu0 }
  0x83   :  { %v321_v21 = vadd.f32 %v206_v18, %v57_v20 }
  0x85   :  { %v205_v24 = vmul.f32 -1.442695, %v321_v21 }
  0x87   :  { %210 = vpow2.f32 %v205_v24 }
  0x8d   :  { %v211_v29 = vpop.eup %210 }
  0x8e   :  { %v63_v31 = vadd.f32 1.0, %v211_v29 }
  0x90   :  { %212 = vrcp.f32 %v63_v31  ;;  %v75_v41 = vand.u32 2147483648, %v63_v31  ;;  %v73_v43 = vand.u32 2147483647, %v63_v31  ;;  %vm69_vm2 = vweird.f32 %v63_v31 }
  0x92   :  { %v76_v46 = vor.u32 1.1754944e-38, %v75_v41  ;;  %vm74_vm4 = vcmp.eq.f32.partialorder %v73_v43, 8.507059e+37 }
  0x96   :  { %v213_v36 = vpop.eup %212 }
  0x97   :  { %v65_v37 = vmul.f32 %v213_v36, %v63_v31  ;;  %vm70_vm1 = vweird.f32 %v213_v36 }
  0x98   :  { %vm71_vm3 = vmor %vm69_vm2, %vm70_vm1 }
  0x99   :  { %v66_v39 = vsub.f32 1.0, %v65_v37 }
  0x9b   :  { %v67_v42 = vmul.f32 %v213_v36, %v66_v39 }
  0x9d   :  { %v68_v45 = vadd.f32 %v213_v36, %v67_v42 }
  0x9f   :  { %v72_v47 = vsel %vm71_vm3, %v213_v36, %v68_v45 }
  0xa0   :  { %v77_v48 = vsel %vm74_vm4, %v76_v46, %v72_v47 }
  0xa1   :  { %v79_v49 = vmul.f32 %v77_v48, %v321_v21 }
  0xa3   :  { %116 = vmatmul.f32.vlgmr.msra.gmra.mxu1 %v79_v49 }
 0x120   :  { %v117_v53 = vpop.f32.mrf.mxu1 }
 0x121   :  { %v118_v54 = vadd.f32 %v207_v52, %v117_v53 }
 0x123   :  { %152 = vmatmul.f32.vlgmr.msra.gmra.mxu2 %v118_v54 }
 0x1a6   :  { %v153_v55 = vpop.f32.mrf.mxu2 }
 0x1a7   :  { %v156_v56 = vsub.f32 %v118_v54, %v153_v55 }
 0x1a9   :  { %v157_v57 = vmul.f32 %v156_v56, %v156_v56 }
 0x1ab   :  { %174 = vmatmul.f32.vlgmr.msra.gmra.mxu3 %v157_v57 }
 0x22e   :  { %v175_v58 = vpop.f32.mrf.mxu3 }
 0x22f   :  { %v176_v59 = vadd.f32 1e-05, %v175_v58 }
 0x231   :  { %214 = vrsqrt.f32 %v176_v59  ;;  %vm184_vm6 = vweird.f32 %v176_v59 }
 0x237   :  { %v215_v60 = vpop.eup %214 }
 0x238   :  { %v179_v61 = vmul.f32 %v215_v60, %v176_v59  ;;  %vm185_vm5 = vweird.f32 %v215_v60 }
 0x239   :  { %vm186_vm7 = vmor %vm184_vm6, %vm185_vm5 }
 0x23a   :  { %v180_v62 = vmul.f32 %v215_v60, %v179_v61 }
 0x23c   :  { %v181_v63 = vmul.f32 0.5, %v180_v62 }
 0x23e   :  { %v182_v0 = vsub.f32 1.5, %v181_v63 }
 0x240   :  { %v183_v1 = vmul.f32 %v215_v60, %v182_v0 }
 0x242   :  { %v187_v3 = vsel %vm186_vm7, %v215_v60, %v183_v1 }
 0x243   :  { %v188_v4 = vmul.f32 %v187_v3, %v156_v56 }
 0x245   :  { %v193_v6 = vmul.f32 %v208_v2, %v188_v4 }
 0x247   :  { %v198_v7 = vadd.f32 %v209_v5, %v193_v6 }
 0x249   :  { %199 = vst [vmem:[%s393_s8] sm:$0xff] %v198_v7 }

</bundles_post_ra>
